<compile_context>
chip_gen: v7x
topology: tpu7x:2x2x1
jax: 0.10.0
libtpu: 0.0.40
codegen_flags: <defaults>
</compile_context>

<pallas_src>
import functools

import numpy as np
import jax
import jax.numpy as jnp
from jax import lax
from jax.experimental import pallas as pl
from jax.experimental.pallas import tpu as pltpu


# ----------------------------------------------------------------------------
# Fused kernel: upconv -> (implicit concat) -> conv1+BN+ReLU -> conv2+BN+ReLU
# One batch element per grid step; all intermediates stay in VMEM.
# Row layout everywhere: a 2-D tile (rows, width*channels), channels fused
# into the lane axis.
# ----------------------------------------------------------------------------
def _decoder_kernel(x_ref, skip_ref, aup_ref, bup_ref,
                    w1s_ref, w1u_ref, s1_ref, b1_ref,
                    w2_ref, s2_ref, b2_ref,
                    o_ref,
                    skip_pad, up_pad, h_pad,
                    *, H, W, Co):
    f32 = jnp.float32
    H2, W2 = 2 * H, 2 * W
    WoCo = W2 * Co                 # un-padded output row width (lanes)
    P = (W2 + 2) * Co              # padded row width (1-pixel halo each side)

    # --- zero the halo buffers (scratch persists across grid steps) ---------
    skip_pad[...] = jnp.zeros_like(skip_pad)
    up_pad[...] = jnp.zeros_like(up_pad)
    h_pad[...] = jnp.zeros_like(h_pad)

    # --- skip connection -> padded VMEM buffer (no HBM concat) --------------
    skip_pad[1:1 + H2, Co:Co + WoCo] = skip_ref[0].astype(f32)

    # --- ConvTranspose2d(2x2, stride 2): ONE matmul, 128 output lanes -------
    # aup columns are ordered (di, 2*j+dj, c); bias is pre-tiled to match.
    y = jnp.dot(x_ref[0].astype(f32), aup_ref[...].astype(f32),
                preferred_element_type=f32) + bup_ref[...].astype(f32)
    # Scatter the two row parities (di) into the padded up buffer.  The
    # buffer is shaped (H+1, 2, P) so that padded row 2*a + b == (a, b):
    #   di = 0 -> padded rows 1,3,..,2H-1 -> [0:H,   1, :]
    #   di = 1 -> padded rows 2,4,..,2H   -> [1:H+1, 0, :]
    up_pad[0:H, 1, Co:Co + WoCo] = y[:, :WoCo]
    up_pad[1:1 + H, 0, Co:Co + WoCo] = y[:, WoCo:]

    up_rows = up_pad[...].reshape(H2 + 2, P)   # padded up image, 2-D row view
    skip_rows = skip_pad[...]

    # --- conv1 (3x3, pad 1) + BN + ReLU: 3 banded row matmuls per input -----
    # conv1's input channels are the concat (skip, up); the concat is never
    # materialised -- its two halves accumulate into the same f32 acc.
    acc = jnp.zeros((H2, WoCo), f32)
    for ky in range(3):
        acc = acc + jnp.dot(skip_rows[ky:ky + H2, :], w1s_ref[ky].astype(f32),
                            preferred_element_type=f32)
        acc = acc + jnp.dot(up_rows[ky:ky + H2, :], w1u_ref[ky].astype(f32),
                            preferred_element_type=f32)
    h = jnp.maximum(acc * s1_ref[...] + b1_ref[...], 0.0)
    h_pad[1:1 + H2, Co:Co + WoCo] = h

    # --- conv2 (3x3, pad 1) + BN + ReLU --------------------------------------
    h_rows = h_pad[...]
    acc2 = jnp.zeros((H2, WoCo), f32)
    for ky in range(3):
        acc2 = acc2 + jnp.dot(h_rows[ky:ky + H2, :], w2_ref[ky].astype(f32),
                              preferred_element_type=f32)
    out = jnp.maximum(acc2 * s2_ref[...] + b2_ref[...], 0.0)
    o_ref[0] = out.astype(o_ref.dtype)


# ----------------------------------------------------------------------------
# Static weight restructuring (glue, runs in XLA once per call, tiny tensors).
# ----------------------------------------------------------------------------
def _upconv_band(up_w, W):
    """ConvTranspose2d(2,2,s=2) weight (Cin,Co,2,2) -> (W*Cin, 2*(2W)*Co).

    Output columns ordered q = di*(2W*Co) + (2j+dj)*Co + c."""
    Cin, Co = up_w.shape[0], up_w.shape[1]
    T = jnp.transpose(up_w, (0, 2, 3, 1))              # (ci, di, dj, c)
    I_W = jnp.eye(W, dtype=up_w.dtype)
    B = (I_W[:, None, None, :, None, None] *
         T[None, :, :, None, :, :])                    # (j, ci, di, j2, dj, c)
    return B.reshape(W * Cin, 2 * (2 * W) * Co)


def _conv_band(w, Wo):
    """Conv2d 3x3 weight (Co, Cblk, 3, 3) -> banded (3, (Wo+2)*Cblk, Wo*Co).

    For row-shift ky:  out[r, j*Co+c] += sum_{kx,ci} in_pad[r+ky, (j+kx)*Cblk+ci]
                                               * w[c, ci, ky, kx]."""
    Co, Cblk = w.shape[0], w.shape[1]
    D = np.zeros((Wo, 3, Wo + 2), np.float32)
    for j in range(Wo):
        for kx in range(3):
            D[j, kx, j + kx] = 1.0
    D = jnp.asarray(D, dtype=w.dtype)
    Wt = jnp.transpose(w, (2, 3, 1, 0))                # (ky, kx, ci, c)
    Wb = jnp.einsum('jxJ,yxio->yJijo', D, Wt)          # (ky, jj, ci, j, c)
    return Wb.reshape(3, (Wo + 2) * Cblk, Wo * Co)


# ----------------------------------------------------------------------------
# DecoderStep forward
# ----------------------------------------------------------------------------
def decoder_step_forward(params, x_nchw, skip_nchw, eps=1e-5):
    N, Cin, H, W = x_nchw.shape
    Co = params["up_b"].shape[0]
    H2, W2 = 2 * H, 2 * W
    WoCo = W2 * Co
    P = (W2 + 2) * Co

    # NCHW -> (rows, W*C) row-major layout (the trailing reshape is free).
    x2 = jnp.transpose(x_nchw, (0, 2, 3, 1)).reshape(N, H, W * Cin)
    skip2 = jnp.transpose(skip_nchw, (0, 2, 3, 1)).reshape(N, H2, WoCo)

    # Upconv banded weight + column-tiled bias.
    aup = _upconv_band(params["up_w"], W)                       # (W*Cin, 2*WoCo)
    bup = jnp.tile(params["up_b"], 2 * W2).reshape(1, 2 * WoCo)

    # Fold BatchNorm (eval) into per-channel scale/bias, tiled along columns.
    def fold(conv_b, g, b, m, v):
        s = g / jnp.sqrt(v + eps)
        return s, s * (conv_b - m) + b

    s1, b1 = fold(params["c1_b"], params["bn1_g"], params["bn1_b"],
                  params["bn1_m"], params["bn1_v"])
    s2, b2 = fold(params["c2_b"], params["bn2_g"], params["bn2_b"],
                  params["bn2_m"], params["bn2_v"])
    s1t = jnp.tile(s1, W2).reshape(1, WoCo)
    b1t = jnp.tile(b1, W2).reshape(1, WoCo)
    s2t = jnp.tile(s2, W2).reshape(1, WoCo)
    b2t = jnp.tile(b2, W2).reshape(1, WoCo)

    # conv1 input channels = concat(skip, up): split its weight accordingly.
    w1s = _conv_band(params["c1_w"][:, :Co], W2)     # skip half
    w1u = _conv_band(params["c1_w"][:, Co:], W2)     # upconv half
    w2b = _conv_band(params["c2_w"], W2)

    kernel = functools.partial(_decoder_kernel, H=H, W=W, Co=Co)

    out2 = pl.pallas_call(
        kernel,
        out_shape=jax.ShapeDtypeStruct((N, H2, WoCo), x_nchw.dtype),
        grid=(N,),
        in_specs=[
            pl.BlockSpec((1, H, W * Cin), lambda n: (n, 0, 0)),      # x
            pl.BlockSpec((1, H2, WoCo), lambda n: (n, 0, 0)),        # skip
            pl.BlockSpec((W * Cin, 2 * WoCo), lambda n: (0, 0)),     # aup
            pl.BlockSpec((1, 2 * WoCo), lambda n: (0, 0)),           # bup
            pl.BlockSpec((3, P, WoCo), lambda n: (0, 0, 0)),         # w1 (skip)
            pl.BlockSpec((3, P, WoCo), lambda n: (0, 0, 0)),         # w1 (up)
            pl.BlockSpec((1, WoCo), lambda n: (0, 0)),               # s1
            pl.BlockSpec((1, WoCo), lambda n: (0, 0)),               # b1
            pl.BlockSpec((3, P, WoCo), lambda n: (0, 0, 0)),         # w2
            pl.BlockSpec((1, WoCo), lambda n: (0, 0)),               # s2
            pl.BlockSpec((1, WoCo), lambda n: (0, 0)),               # b2
        ],
        out_specs=pl.BlockSpec((1, H2, WoCo), lambda n: (n, 0, 0)),
        scratch_shapes=[
            pltpu.VMEM((H2 + 2, P), jnp.float32),      # padded skip image
            pltpu.VMEM((H + 1, 2, P), jnp.float32),    # padded upconv image
            pltpu.VMEM((H2 + 2, P), jnp.float32),      # padded conv1 output
        ],
        compiler_params=pltpu.CompilerParams(
            dimension_semantics=("parallel",)),
    )(x2, skip2, aup, bup, w1s, w1u, s1t, b1t, w2b, s2t, b2t)

    # (N, 2H, 2W*Co) -> NCHW
    return jnp.transpose(out2.reshape(N, H2, W2, Co), (0, 3, 1, 2))


# ----------------------------------------------------------------------------
# Pure-JAX reference (BatchNorm in eval mode, same as the kernel).
# ----------------------------------------------------------------------------
def _reference_forward(params, x, skip, eps=1e-5):
    N, Cin, H, W = x.shape
    Co = params["up_b"].shape[0]
    up = jnp.einsum('ncij,code->noidje', x, params["up_w"])
    up = up.reshape(N, Co, 2 * H, 2 * W) + params["up_b"][None, :, None, None]
    cat = jnp.concatenate([skip, up], axis=1)

    def conv_bn_relu(z, w, cb, g, b, m, v):
        y = lax.conv_general_dilated(z, w, (1, 1), "SAME",
                                     dimension_numbers=("NCHW", "OIHW", "NCHW"))
        y = y + cb[None, :, None, None]
        y = ((y - m[None, :, None, None]) * (g / jnp.sqrt(v + eps))[None, :, None, None]
             + b[None, :, None, None])
        return jnp.maximum(y, 0.0)

    h = conv_bn_relu(cat, params["c1_w"], params["c1_b"], params["bn1_g"],
                     params["bn1_b"], params["bn1_m"], params["bn1_v"])
    return conv_bn_relu(h, params["c2_w"], params["c2_b"], params["bn2_g"],
                        params["bn2_b"], params["bn2_m"], params["bn2_v"])


def init_params(key, in_channels, out_channels):
    ks = jax.random.split(key, 12)
    co, ci = out_channels, in_channels
    return {
        # ConvTranspose2d(in, out, k=2, s=2): weight (Cin, Cout, 2, 2)
        "up_w": jax.random.normal(ks[0], (ci, co, 2, 2), jnp.float32) * 0.1,
        "up_b": jax.random.normal(ks[1], (co,), jnp.float32) * 0.1,
        # Conv2d(2*out, out, 3, pad=1)
        "c1_w": jax.random.normal(ks[2], (co, 2 * co, 3, 3), jnp.float32) * 0.1,
        "c1_b": jax.random.normal(ks[3], (co,), jnp.float32) * 0.1,
        "bn1_g": 1.0 + 0.1 * jax.random.normal(ks[4], (co,), jnp.float32),
        "bn1_b": 0.1 * jax.random.normal(ks[5], (co,), jnp.float32),
        "bn1_m": 0.1 * jax.random.normal(ks[6], (co,), jnp.float32),
        "bn1_v": 1.0 + 0.1 * jax.random.uniform(ks[7], (co,), jnp.float32),
        # Conv2d(out, out, 3, pad=1)
        "c2_w": jax.random.normal(ks[8], (co, co, 3, 3), jnp.float32) * 0.1,
        "c2_b": jax.random.normal(ks[9], (co,), jnp.float32) * 0.1,
        "bn2_g": 1.0 + 0.1 * jax.random.normal(ks[10], (co,), jnp.float32),
        "bn2_b": 0.1 * jax.random.normal(ks[11], (co,), jnp.float32),
        "bn2_m": jnp.zeros((co,), jnp.float32),
        "bn2_v": jnp.ones((co,), jnp.float32),
    }


if __name__ == "__main__":
    key = jax.random.PRNGKey(0)
    k_p, k_x, k_s = jax.random.split(key, 3)

    in_channels, out_channels = 8, 4
    N, H, W = 2, 8, 8
    x = jax.random.normal(k_x, (N, in_channels, H, W), jnp.float32)            # NCHW
    skip_con = jax.random.normal(k_s, (N, out_channels, 2 * H, 2 * W),
                                 jnp.float32)                                  # NCHW

    params = init_params(k_p, in_channels, out_channels)

    y = jax.jit(decoder_step_forward)(params, x, skip_con)
    jax.block_until_ready(y)
    assert y.shape == (N, out_channels, 2 * H, 2 * W), y.shape

    # numerical self-check against a plain-JAX reference (eval-mode BN)
    y_ref = jax.jit(_reference_forward)(params, x, skip_con)
    err = float(jnp.max(jnp.abs(y - y_ref)))
    assert err < 5e-2, f"max abs err {err}"

    print("KERNEL_OK")
</pallas_src>

<mosaic_0001>
module attributes {stable_mosaic.version = 11 : i64} {
  func.func @_decoder_kernel(%arg0: i32, %arg1: memref<1x8x64xf32, #tpu.memory_space<vmem>>, %arg2: memref<1x16x64xf32, #tpu.memory_space<vmem>>, %arg3: memref<64x128xf32, #tpu.memory_space<vmem>>, %arg4: memref<1x128xf32, #tpu.memory_space<vmem>>, %arg5: memref<3x72x64xf32, #tpu.memory_space<vmem>>, %arg6: memref<3x72x64xf32, #tpu.memory_space<vmem>>, %arg7: memref<1x64xf32, #tpu.memory_space<vmem>>, %arg8: memref<1x64xf32, #tpu.memory_space<vmem>>, %arg9: memref<3x72x64xf32, #tpu.memory_space<vmem>>, %arg10: memref<1x64xf32, #tpu.memory_space<vmem>>, %arg11: memref<1x64xf32, #tpu.memory_space<vmem>>, %arg12: memref<1x16x64xf32, #tpu.memory_space<vmem>>, %arg13: memref<18x72xf32, #tpu.memory_space<vmem>>, %arg14: memref<9x2x72xf32, #tpu.memory_space<vmem>>, %arg15: memref<18x72xf32, #tpu.memory_space<vmem>>) attributes {dimension_semantics = [#tpu.dimension_semantics<parallel>], iteration_bounds = array<i64: 2>, scalar_prefetch = 0 : i64, scratch_operands = 3 : i64, tpu.core_type = #tpu.core_type<tc>, window_params = [{transform_indices = @transform_0, window_bounds = array<i64: 1, 8, 64>}, {transform_indices = @transform_1, window_bounds = array<i64: 1, 16, 64>}, {pipeline_mode = #tpu.pipeline_mode<synchronous>, transform_indices = @transform_2, window_bounds = array<i64: 64, 128>}, {pipeline_mode = #tpu.pipeline_mode<synchronous>, transform_indices = @transform_3, window_bounds = array<i64: 1, 128>}, {pipeline_mode = #tpu.pipeline_mode<synchronous>, transform_indices = @transform_4, window_bounds = array<i64: 3, 72, 64>}, {pipeline_mode = #tpu.pipeline_mode<synchronous>, transform_indices = @transform_5, window_bounds = array<i64: 3, 72, 64>}, {pipeline_mode = #tpu.pipeline_mode<synchronous>, transform_indices = @transform_6, window_bounds = array<i64: 1, 64>}, {pipeline_mode = #tpu.pipeline_mode<synchronous>, transform_indices = @transform_7, window_bounds = array<i64: 1, 64>}, {pipeline_mode = #tpu.pipeline_mode<synchronous>, transform_indices = @transform_8, window_bounds = array<i64: 3, 72, 64>}, {pipeline_mode = #tpu.pipeline_mode<synchronous>, transform_indices = @transform_9, window_bounds = array<i64: 1, 64>}, {pipeline_mode = #tpu.pipeline_mode<synchronous>, transform_indices = @transform_10, window_bounds = array<i64: 1, 64>}, {transform_indices = @transform_11, window_bounds = array<i64: 1, 16, 64>}]} {
    %cst = arith.constant 0.000000e+00 : f32
    %0 = vector.broadcast %cst : f32 to vector<18x72xf32>
    %c0 = arith.constant 0 : index
    %c0_0 = arith.constant 0 : index
    %1 = vector.load %arg13[%c0, %c0_0] : memref<18x72xf32, #tpu.memory_space<vmem>>, vector<18x72xf32>
    tpu.vector_store %arg13[%c0, %c0_0], %0 {strides = array<i32>} : memref<18x72xf32, #tpu.memory_space<vmem>>, vector<18x72xf32>,
    %cst_1 = arith.constant 0.000000e+00 : f32
    %2 = vector.broadcast %cst_1 : f32 to vector<9x2x72xf32>
    %c0_2 = arith.constant 0 : index
    %c0_3 = arith.constant 0 : index
    %c0_4 = arith.constant 0 : index
    %3 = vector.load %arg14[%c0_2, %c0_3, %c0_4] : memref<9x2x72xf32, #tpu.memory_space<vmem>>, vector<9x2x72xf32>
    tpu.vector_store %arg14[%c0_2, %c0_3, %c0_4], %2 {strides = array<i32>} : memref<9x2x72xf32, #tpu.memory_space<vmem>>, vector<9x2x72xf32>,
    %cst_5 = arith.constant 0.000000e+00 : f32
    %4 = vector.broadcast %cst_5 : f32 to vector<18x72xf32>
    %c0_6 = arith.constant 0 : index
    %c0_7 = arith.constant 0 : index
    %5 = vector.load %arg15[%c0_6, %c0_7] : memref<18x72xf32, #tpu.memory_space<vmem>>, vector<18x72xf32>
    tpu.vector_store %arg15[%c0_6, %c0_7], %4 {strides = array<i32>} : memref<18x72xf32, #tpu.memory_space<vmem>>, vector<18x72xf32>,
    %c0_8 = arith.constant 0 : index
    %c0_9 = arith.constant 0 : index
    %c0_10 = arith.constant 0 : index
    %6 = vector.load %arg2[%c0_8, %c0_9, %c0_10] : memref<1x16x64xf32, #tpu.memory_space<vmem>>, vector<1x16x64xf32>
    %7 = vector.shape_cast %6 : vector<1x16x64xf32> to vector<16x64xf32>
    %c1 = arith.constant 1 : index
    %c4 = arith.constant 4 : index
    %8 = vector.load %arg13[%c1, %c4] : memref<18x72xf32, #tpu.memory_space<vmem>>, vector<16x64xf32>
    tpu.vector_store %arg13[%c1, %c4], %7 {strides = array<i32>} : memref<18x72xf32, #tpu.memory_space<vmem>>, vector<16x64xf32>,
    %c0_11 = arith.constant 0 : index
    %c0_12 = arith.constant 0 : index
    %c0_13 = arith.constant 0 : index
    %9 = vector.load %arg1[%c0_11, %c0_12, %c0_13] : memref<1x8x64xf32, #tpu.memory_space<vmem>>, vector<1x8x64xf32>
    %10 = vector.shape_cast %9 : vector<1x8x64xf32> to vector<8x64xf32>
    %c0_14 = arith.constant 0 : index
    %c0_15 = arith.constant 0 : index
    %11 = vector.load %arg3[%c0_14, %c0_15] : memref<64x128xf32, #tpu.memory_space<vmem>>, vector<64x128xf32>
    %cst_16 = arith.constant dense<0.000000e+00> : vector<8x128xf32>
    %12 = tpu.matmul %10, %11, %cst_16 {dimension_numbers = #tpu.dot_dimension_numbers<[1], [0], [0], [1], [0, 0, 1, 1], [], []>} : vector<8x64xf32>, vector<64x128xf32>, vector<8x128xf32> -> vector<8x128xf32>
    %c0_17 = arith.constant 0 : index
    %c0_18 = arith.constant 0 : index
    %13 = vector.load %arg4[%c0_17, %c0_18] : memref<1x128xf32, #tpu.memory_space<vmem>>, vector<1x128xf32>
    %14 = vector.broadcast %13 : vector<1x128xf32> to vector<8x128xf32>
    %15 = arith.addf %12, %14 : vector<8x128xf32>
    %16 = vector.extract_strided_slice %15 {offsets = [0, 0], sizes = [8, 64], strides = [1, 1]} : vector<8x128xf32> to vector<8x64xf32>
    %c0_19 = arith.constant 0 : index
    %c1_20 = arith.constant 1 : index
    %c4_21 = arith.constant 4 : index
    %17 = vector.load %arg14[%c0_19, %c1_20, %c4_21] : memref<9x2x72xf32, #tpu.memory_space<vmem>>, vector<8x1x64xf32>
    %18 = vector.shape_cast %17 : vector<8x1x64xf32> to vector<8x64xf32>
    %19 = vector.shape_cast %16 : vector<8x64xf32> to vector<8x1x64xf32>
    tpu.vector_store %arg14[%c0_19, %c1_20, %c4_21], %19 {strides = array<i32>} : memref<9x2x72xf32, #tpu.memory_space<vmem>>, vector<8x1x64xf32>,
    %20 = vector.extract_strided_slice %15 {offsets = [0, 64], sizes = [8, 64], strides = [1, 1]} : vector<8x128xf32> to vector<8x64xf32>
    %c1_22 = arith.constant 1 : index
    %c0_23 = arith.constant 0 : index
    %c4_24 = arith.constant 4 : index
    %21 = vector.load %arg14[%c1_22, %c0_23, %c4_24] : memref<9x2x72xf32, #tpu.memory_space<vmem>>, vector<8x1x64xf32>
    %22 = vector.shape_cast %21 : vector<8x1x64xf32> to vector<8x64xf32>
    %23 = vector.shape_cast %20 : vector<8x64xf32> to vector<8x1x64xf32>
    tpu.vector_store %arg14[%c1_22, %c0_23, %c4_24], %23 {strides = array<i32>} : memref<9x2x72xf32, #tpu.memory_space<vmem>>, vector<8x1x64xf32>,
    %c0_25 = arith.constant 0 : index
    %c0_26 = arith.constant 0 : index
    %c0_27 = arith.constant 0 : index
    %24 = vector.load %arg14[%c0_25, %c0_26, %c0_27] : memref<9x2x72xf32, #tpu.memory_space<vmem>>, vector<9x2x72xf32>
    %25 = vector.shape_cast %24 : vector<9x2x72xf32> to vector<18x72xf32>
    %c0_28 = arith.constant 0 : index
    %c0_29 = arith.constant 0 : index
    %26 = vector.load %arg13[%c0_28, %c0_29] : memref<18x72xf32, #tpu.memory_space<vmem>>, vector<18x72xf32>
    %cst_30 = arith.constant 0.000000e+00 : f32
    %27 = vector.broadcast %cst_30 : f32 to vector<16x64xf32>
    %28 = vector.extract_strided_slice %26 {offsets = [0, 0], sizes = [16, 72], strides = [1, 1]} : vector<18x72xf32> to vector<16x72xf32>
    %c0_31 = arith.constant 0 : index
    %c0_32 = arith.constant 0 : index
    %c0_33 = arith.constant 0 : index
    %29 = vector.load %arg5[%c0_31, %c0_32, %c0_33] : memref<3x72x64xf32, #tpu.memory_space<vmem>>, vector<1x72x64xf32>
    %30 = vector.shape_cast %29 : vector<1x72x64xf32> to vector<72x64xf32>
    %cst_34 = arith.constant dense<0.000000e+00> : vector<16x64xf32>
    %31 = tpu.matmul %28, %30, %cst_34 {dimension_numbers = #tpu.dot_dimension_numbers<[1], [0], [0], [1], [0, 0, 1, 1], [], []>} : vector<16x72xf32>, vector<72x64xf32>, vector<16x64xf32> -> vector<16x64xf32>
    %32 = arith.addf %27, %31 : vector<16x64xf32>
    %33 = vector.extract_strided_slice %25 {offsets = [0, 0], sizes = [16, 72], strides = [1, 1]} : vector<18x72xf32> to vector<16x72xf32>
    %c0_35 = arith.constant 0 : index
    %c0_36 = arith.constant 0 : index
    %c0_37 = arith.constant 0 : index
    %34 = vector.load %arg6[%c0_35, %c0_36, %c0_37] : memref<3x72x64xf32, #tpu.memory_space<vmem>>, vector<1x72x64xf32>
    %35 = vector.shape_cast %34 : vector<1x72x64xf32> to vector<72x64xf32>
    %cst_38 = arith.constant dense<0.000000e+00> : vector<16x64xf32>
    %36 = tpu.matmul %33, %35, %cst_38 {dimension_numbers = #tpu.dot_dimension_numbers<[1], [0], [0], [1], [0, 0, 1, 1], [], []>} : vector<16x72xf32>, vector<72x64xf32>, vector<16x64xf32> -> vector<16x64xf32>
    %37 = arith.addf %32, %36 : vector<16x64xf32>
    %38 = vector.extract_strided_slice %26 {offsets = [1, 0], sizes = [16, 72], strides = [1, 1]} : vector<18x72xf32> to vector<16x72xf32>
    %c1_39 = arith.constant 1 : index
    %c0_40 = arith.constant 0 : index
    %c0_41 = arith.constant 0 : index
    %39 = vector.load %arg5[%c1_39, %c0_40, %c0_41] : memref<3x72x64xf32, #tpu.memory_space<vmem>>, vector<1x72x64xf32>
    %40 = vector.shape_cast %39 : vector<1x72x64xf32> to vector<72x64xf32>
    %cst_42 = arith.constant dense<0.000000e+00> : vector<16x64xf32>
    %41 = tpu.matmul %38, %40, %cst_42 {dimension_numbers = #tpu.dot_dimension_numbers<[1], [0], [0], [1], [0, 0, 1, 1], [], []>} : vector<16x72xf32>, vector<72x64xf32>, vector<16x64xf32> -> vector<16x64xf32>
    %42 = arith.addf %37, %41 : vector<16x64xf32>
    %43 = vector.extract_strided_slice %25 {offsets = [1, 0], sizes = [16, 72], strides = [1, 1]} : vector<18x72xf32> to vector<16x72xf32>
    %c1_43 = arith.constant 1 : index
    %c0_44 = arith.constant 0 : index
    %c0_45 = arith.constant 0 : index
    %44 = vector.load %arg6[%c1_43, %c0_44, %c0_45] : memref<3x72x64xf32, #tpu.memory_space<vmem>>, vector<1x72x64xf32>
    %45 = vector.shape_cast %44 : vector<1x72x64xf32> to vector<72x64xf32>
    %cst_46 = arith.constant dense<0.000000e+00> : vector<16x64xf32>
    %46 = tpu.matmul %43, %45, %cst_46 {dimension_numbers = #tpu.dot_dimension_numbers<[1], [0], [0], [1], [0, 0, 1, 1], [], []>} : vector<16x72xf32>, vector<72x64xf32>, vector<16x64xf32> -> vector<16x64xf32>
    %47 = arith.addf %42, %46 : vector<16x64xf32>
    %48 = vector.extract_strided_slice %26 {offsets = [2, 0], sizes = [16, 72], strides = [1, 1]} : vector<18x72xf32> to vector<16x72xf32>
    %c2 = arith.constant 2 : index
    %c0_47 = arith.constant 0 : index
    %c0_48 = arith.constant 0 : index
    %49 = vector.load %arg5[%c2, %c0_47, %c0_48] : memref<3x72x64xf32, #tpu.memory_space<vmem>>, vector<1x72x64xf32>
    %50 = vector.shape_cast %49 : vector<1x72x64xf32> to vector<72x64xf32>
    %cst_49 = arith.constant dense<0.000000e+00> : vector<16x64xf32>
    %51 = tpu.matmul %48, %50, %cst_49 {dimension_numbers = #tpu.dot_dimension_numbers<[1], [0], [0], [1], [0, 0, 1, 1], [], []>} : vector<16x72xf32>, vector<72x64xf32>, vector<16x64xf32> -> vector<16x64xf32>
    %52 = arith.addf %47, %51 : vector<16x64xf32>
    %53 = vector.extract_strided_slice %25 {offsets = [2, 0], sizes = [16, 72], strides = [1, 1]} : vector<18x72xf32> to vector<16x72xf32>
    %c2_50 = arith.constant 2 : index
    %c0_51 = arith.constant 0 : index
    %c0_52 = arith.constant 0 : index
    %54 = vector.load %arg6[%c2_50, %c0_51, %c0_52] : memref<3x72x64xf32, #tpu.memory_space<vmem>>, vector<1x72x64xf32>
    %55 = vector.shape_cast %54 : vector<1x72x64xf32> to vector<72x64xf32>
    %cst_53 = arith.constant dense<0.000000e+00> : vector<16x64xf32>
    %56 = tpu.matmul %53, %55, %cst_53 {dimension_numbers = #tpu.dot_dimension_numbers<[1], [0], [0], [1], [0, 0, 1, 1], [], []>} : vector<16x72xf32>, vector<72x64xf32>, vector<16x64xf32> -> vector<16x64xf32>
    %57 = arith.addf %52, %56 : vector<16x64xf32>
    %c0_54 = arith.constant 0 : index
    %c0_55 = arith.constant 0 : index
    %58 = vector.load %arg7[%c0_54, %c0_55] : memref<1x64xf32, #tpu.memory_space<vmem>>, vector<1x64xf32>
    %59 = vector.broadcast %58 : vector<1x64xf32> to vector<16x64xf32>
    %60 = arith.mulf %57, %59 : vector<16x64xf32>
    %c0_56 = arith.constant 0 : index
    %c0_57 = arith.constant 0 : index
    %61 = vector.load %arg8[%c0_56, %c0_57] : memref<1x64xf32, #tpu.memory_space<vmem>>, vector<1x64xf32>
    %62 = vector.broadcast %61 : vector<1x64xf32> to vector<16x64xf32>
    %63 = arith.addf %60, %62 : vector<16x64xf32>
    %cst_58 = arith.constant 0.000000e+00 : f32
    %64 = vector.broadcast %cst_58 : f32 to vector<16x64xf32>
    %65 = arith.maximumf %63, %64 : vector<16x64xf32>
    %c1_59 = arith.constant 1 : index
    %c4_60 = arith.constant 4 : index
    %66 = vector.load %arg15[%c1_59, %c4_60] : memref<18x72xf32, #tpu.memory_space<vmem>>, vector<16x64xf32>
    tpu.vector_store %arg15[%c1_59, %c4_60], %65 {strides = array<i32>} : memref<18x72xf32, #tpu.memory_space<vmem>>, vector<16x64xf32>,
    %c0_61 = arith.constant 0 : index
    %c0_62 = arith.constant 0 : index
    %67 = vector.load %arg15[%c0_61, %c0_62] : memref<18x72xf32, #tpu.memory_space<vmem>>, vector<18x72xf32>
    %cst_63 = arith.constant 0.000000e+00 : f32
    %68 = vector.broadcast %cst_63 : f32 to vector<16x64xf32>
    %69 = vector.extract_strided_slice %67 {offsets = [0, 0], sizes = [16, 72], strides = [1, 1]} : vector<18x72xf32> to vector<16x72xf32>
    %c0_64 = arith.constant 0 : index
    %c0_65 = arith.constant 0 : index
    %c0_66 = arith.constant 0 : index
    %70 = vector.load %arg9[%c0_64, %c0_65, %c0_66] : memref<3x72x64xf32, #tpu.memory_space<vmem>>, vector<1x72x64xf32>
    %71 = vector.shape_cast %70 : vector<1x72x64xf32> to vector<72x64xf32>
    %cst_67 = arith.constant dense<0.000000e+00> : vector<16x64xf32>
    %72 = tpu.matmul %69, %71, %cst_67 {dimension_numbers = #tpu.dot_dimension_numbers<[1], [0], [0], [1], [0, 0, 1, 1], [], []>} : vector<16x72xf32>, vector<72x64xf32>, vector<16x64xf32> -> vector<16x64xf32>
    %73 = arith.addf %68, %72 : vector<16x64xf32>
    %74 = vector.extract_strided_slice %67 {offsets = [1, 0], sizes = [16, 72], strides = [1, 1]} : vector<18x72xf32> to vector<16x72xf32>
    %c1_68 = arith.constant 1 : index
    %c0_69 = arith.constant 0 : index
    %c0_70 = arith.constant 0 : index
    %75 = vector.load %arg9[%c1_68, %c0_69, %c0_70] : memref<3x72x64xf32, #tpu.memory_space<vmem>>, vector<1x72x64xf32>
    %76 = vector.shape_cast %75 : vector<1x72x64xf32> to vector<72x64xf32>
    %cst_71 = arith.constant dense<0.000000e+00> : vector<16x64xf32>
    %77 = tpu.matmul %74, %76, %cst_71 {dimension_numbers = #tpu.dot_dimension_numbers<[1], [0], [0], [1], [0, 0, 1, 1], [], []>} : vector<16x72xf32>, vector<72x64xf32>, vector<16x64xf32> -> vector<16x64xf32>
    %78 = arith.addf %73, %77 : vector<16x64xf32>
    %79 = vector.extract_strided_slice %67 {offsets = [2, 0], sizes = [16, 72], strides = [1, 1]} : vector<18x72xf32> to vector<16x72xf32>
    %c2_72 = arith.constant 2 : index
    %c0_73 = arith.constant 0 : index
    %c0_74 = arith.constant 0 : index
    %80 = vector.load %arg9[%c2_72, %c0_73, %c0_74] : memref<3x72x64xf32, #tpu.memory_space<vmem>>, vector<1x72x64xf32>
    %81 = vector.shape_cast %80 : vector<1x72x64xf32> to vector<72x64xf32>
    %cst_75 = arith.constant dense<0.000000e+00> : vector<16x64xf32>
    %82 = tpu.matmul %79, %81, %cst_75 {dimension_numbers = #tpu.dot_dimension_numbers<[1], [0], [0], [1], [0, 0, 1, 1], [], []>} : vector<16x72xf32>, vector<72x64xf32>, vector<16x64xf32> -> vector<16x64xf32>
    %83 = arith.addf %78, %82 : vector<16x64xf32>
    %c0_76 = arith.constant 0 : index
    %c0_77 = arith.constant 0 : index
    %84 = vector.load %arg10[%c0_76, %c0_77] : memref<1x64xf32, #tpu.memory_space<vmem>>, vector<1x64xf32>
    %85 = vector.broadcast %84 : vector<1x64xf32> to vector<16x64xf32>
    %86 = arith.mulf %83, %85 : vector<16x64xf32>
    %c0_78 = arith.constant 0 : index
    %c0_79 = arith.constant 0 : index
    %87 = vector.load %arg11[%c0_78, %c0_79] : memref<1x64xf32, #tpu.memory_space<vmem>>, vector<1x64xf32>
    %88 = vector.broadcast %87 : vector<1x64xf32> to vector<16x64xf32>
    %89 = arith.addf %86, %88 : vector<16x64xf32>
    %cst_80 = arith.constant 0.000000e+00 : f32
    %90 = vector.broadcast %cst_80 : f32 to vector<16x64xf32>
    %91 = arith.maximumf %89, %90 : vector<16x64xf32>
    %c0_81 = arith.constant 0 : index
    %c0_82 = arith.constant 0 : index
    %c0_83 = arith.constant 0 : index
    %92 = vector.load %arg12[%c0_81, %c0_82, %c0_83] : memref<1x16x64xf32, #tpu.memory_space<vmem>>, vector<1x16x64xf32>
    %93 = vector.shape_cast %92 : vector<1x16x64xf32> to vector<16x64xf32>
    %94 = vector.shape_cast %91 : vector<16x64xf32> to vector<1x16x64xf32>
    tpu.vector_store %arg12[%c0_81, %c0_82, %c0_83], %94 {strides = array<i32>} : memref<1x16x64xf32, #tpu.memory_space<vmem>>, vector<1x16x64xf32>,
    return
  }
  func.func @transform_0(%arg0: i32) -> (i32, i32, i32) {
    %c0_i32 = arith.constant 0 : i32
    %c0_i32_0 = arith.constant 0 : i32
    %c0_i32_1 = arith.constant 0 : i32
    return %arg0, %c0_i32, %c0_i32_0 : i32, i32, i32
  }
  func.func @transform_1(%arg0: i32) -> (i32, i32, i32) {
    %c0_i32 = arith.constant 0 : i32
    %c0_i32_0 = arith.constant 0 : i32
    %c0_i32_1 = arith.constant 0 : i32
    return %arg0, %c0_i32, %c0_i32_0 : i32, i32, i32
  }
  func.func @transform_2(%arg0: i32) -> (i32, i32) {
    %c0_i32 = arith.constant 0 : i32
    %c0_i32_0 = arith.constant 0 : i32
    %c0_i32_1 = arith.constant 0 : i32
    return %c0_i32, %c0_i32_0 : i32, i32
  }
  func.func @transform_3(%arg0: i32) -> (i32, i32) {
    %c0_i32 = arith.constant 0 : i32
    %c0_i32_0 = arith.constant 0 : i32
    %c0_i32_1 = arith.constant 0 : i32
    return %c0_i32, %c0_i32_0 : i32, i32
  }
  func.func @transform_4(%arg0: i32) -> (i32, i32, i32) {
    %c0_i32 = arith.constant 0 : i32
    %c0_i32_0 = arith.constant 0 : i32
    %c0_i32_1 = arith.constant 0 : i32
    %c0_i32_2 = arith.constant 0 : i32
    return %c0_i32, %c0_i32_0, %c0_i32_1 : i32, i32, i32
  }
  func.func @transform_5(%arg0: i32) -> (i32, i32, i32) {
    %c0_i32 = arith.constant 0 : i32
    %c0_i32_0 = arith.constant 0 : i32
    %c0_i32_1 = arith.constant 0 : i32
    %c0_i32_2 = arith.constant 0 : i32
    return %c0_i32, %c0_i32_0, %c0_i32_1 : i32, i32, i32
  }
  func.func @transform_6(%arg0: i32) -> (i32, i32) {
    %c0_i32 = arith.constant 0 : i32
    %c0_i32_0 = arith.constant 0 : i32
    %c0_i32_1 = arith.constant 0 : i32
    return %c0_i32, %c0_i32_0 : i32, i32
  }
  func.func @transform_7(%arg0: i32) -> (i32, i32) {
    %c0_i32 = arith.constant 0 : i32
    %c0_i32_0 = arith.constant 0 : i32
    %c0_i32_1 = arith.constant 0 : i32
    return %c0_i32, %c0_i32_0 : i32, i32
  }
  func.func @transform_8(%arg0: i32) -> (i32, i32, i32) {
    %c0_i32 = arith.constant 0 : i32
    %c0_i32_0 = arith.constant 0 : i32
    %c0_i32_1 = arith.constant 0 : i32
    %c0_i32_2 = arith.constant 0 : i32
    return %c0_i32, %c0_i32_0, %c0_i32_1 : i32, i32, i32
  }
  func.func @transform_9(%arg0: i32) -> (i32, i32) {
    %c0_i32 = arith.constant 0 : i32
    %c0_i32_0 = arith.constant 0 : i32
    %c0_i32_1 = arith.constant 0 : i32
    return %c0_i32, %c0_i32_0 : i32, i32
  }
  func.func @transform_10(%arg0: i32) -> (i32, i32) {
    %c0_i32 = arith.constant 0 : i32
    %c0_i32_0 = arith.constant 0 : i32
    %c0_i32_1 = arith.constant 0 : i32
    return %c0_i32, %c0_i32_0 : i32, i32
  }
  func.func @transform_11(%arg0: i32) -> (i32, i32, i32) {
    %c0_i32 = arith.constant 0 : i32
    %c0_i32_0 = arith.constant 0 : i32
    %c0_i32_1 = arith.constant 0 : i32
    return %arg0, %c0_i32, %c0_i32_0 : i32, i32, i32
  }
}

</mosaic_0001>

<bundles_post_ra>
// kernel: tile.33
= control target key start
LH: loop header
LB: loop body
LE: loop exit
PB: predicated region body
PF: predicated region fallthrough
CT: control target
= control target key end

     0   :  { %s28_s0 = inlined_call_operand.vmem [shape: f32[4], index: 0, kind: input, shape index: {}]   ;;  %s29_s1 = inlined_call_operand.vmem [shape: f32[16,4], index: 1, kind: output, shape index: {}]  }
   0x1   :  { %v4_v0 = vld [vmem:[%s28_s0] ss:$0 sm:$0xff] }
   0x2   :  { %5 = vst [vmem:[%s29_s1] sm:$0xff] %v4_v0  ;;  %8 = vst [vmem:[%s29_s1 + $0x8] sm:$0xff] %v4_v0 }

// kernel: tile.34
= control target key start
LH: loop header
LB: loop body
LE: loop exit
PB: predicated region body
PF: predicated region fallthrough
CT: control target
= control target key end

     0   :  { %s131_s10 = smov 60   ;;  %s132_s11 = smov 52   ;;  %vm3_vm0 = vcmask 31744   ;;  %vm9_vm1 = vcmask 523744   ;;  %vm15_vm2 = vcmask 490944   ;;  %vm21_vm3 = vcmask 458144   ;;  %s207_s0 = inlined_call_operand.vmem [shape: f32[16,4], index: 0, kind: input, shape index: {}]   ;;  %s208_s1 = inlined_call_operand.vmem [shape: f32[1,64], index: 1, kind: output, shape index: {}]  }
   0x1   :  { %v101_v0 = vld [vmem:[%s207_s0 + $0xf] sm:$0x1]   ;;  %v103_v1 = vld [vmem:[%s207_s0 + $0xd] sm:$0x1]   ;;  %v102_v2 = vld [vmem:[%s207_s0 + $0xe] sm:$0x1]  }
   0x2   :  { %7 = vrot.lane.b32.xlu0 %v101_v0, %s131_s10  ;;  %19 = vrot.lane.b32.xlu1 %v103_v1, %s132_s11  ;;  %v104_v3 = vld [vmem:[%s207_s0 + $0xc] sm:$0x1]   ;;  %s133_s16 = smov 56   ;;  %s134_s17 = smov 48   ;;  %v105_v4 = vld [vmem:[%s207_s0 + $0xb] sm:$0x1]  }
   0x3   :  { %v106_v5 = vld [vmem:[%s207_s0 + $0xa] sm:$0x1]   ;;  %v2_v6 = vld [vmem:[%s207_s0] sm:$0x1]   ;;  %s135_s24 = smov 44   ;;  %s136_s25 = smov 40  }
   0x4   :  { %4 = vst.msk [vmem:[#allocation0] sm:$0x1] %vm3_vm0, %v2_v6   ;;  %v107_v7 = vld [vmem:[%s207_s0 + $0x9] sm:$0x1]   ;;  %v108_v8 = vld [vmem:[%s207_s0 + $0x8] sm:$0x1]  }
   0x5   :  { %s137_s30 = smov 36   ;;  %s138_s2 = smov 32   ;;  %v109_v9 = vld [vmem:[%s207_s0 + $0x7] sm:$0x1]   ;;  %v110_v10 = vld [vmem:[%s207_s0 + $0x6] sm:$0x1]  }
   0x6   :  { %13 = vrot.lane.b32.xlu0 %v102_v2, %s133_s16  ;;  %25 = vrot.lane.b32.xlu1 %v104_v3, %s134_s17  ;;  %s139_s7 = smov 28   ;;  %s140_s8 = smov 24   ;;  %v111_v11 = vld [vmem:[%s207_s0 + $0x5] sm:$0x1]   ;;  %v112_v12 = vld [vmem:[%s207_s0 + $0x4] sm:$0x1]  }
   0x7   :  { %s141_s13 = smov 20   ;;  %s142_s14 = smov 16   ;;  %v113_v13 = vld [vmem:[%s207_s0 + $0x3] sm:$0x1]   ;;  %v114_v14 = vld [vmem:[%s207_s0 + $0x2] sm:$0x1]  }
   0x8   :  { %s143_s19 = smov 12   ;;  %s144_s20 = smov 8   ;;  %v115_v15 = vld [vmem:[%s207_s0 + $0x1] sm:$0x1]   ;;  %vm27_vm4 = vcmask 425344   ;;  %vm33_vm5 = vcmask 392544  }
   0x9   :  { %s145_s0 = smov 4   ;;  %vm39_vm6 = vcmask 359744   ;;  %vm45_vm7 = vcmask 326944   ;;  %vm51_vm8 = vcmask 294144   ;;  %vm57_vm9 = vcmask 261344  }
   0xa   :  { %31 = vrot.lane.b32.xlu0 %v105_v4, %s135_s24  ;;  %37 = vrot.lane.b32.xlu1 %v106_v5, %s136_s25  ;;  %vm63_vm10 = vcmask 228544   ;;  %vm69_vm11 = vcmask 195744   ;;  %vm75_vm12 = vcmask 162944   ;;  %vm81_vm13 = vcmask 130144  }
   0xb   :  { %vm87_vm14 = vcmask 97344   ;;  %vm93_vm15 = vcmask 64544  }
   0xe   :  { %43 = vrot.lane.b32.xlu0 %v107_v7, %s137_s30  ;;  %49 = vrot.lane.b32.xlu1 %v108_v8, %s138_s2 }
  0x12   :  { %55 = vrot.lane.b32.xlu0 %v109_v9, %s139_s7  ;;  %61 = vrot.lane.b32.xlu1 %v110_v10, %s140_s8 }
  0x16   :  { %67 = vrot.lane.b32.xlu0 %v111_v11, %s141_s13  ;;  %73 = vrot.lane.b32.xlu1 %v112_v12, %s142_s14 }
  0x1a   :  { %79 = vrot.lane.b32.xlu0 %v113_v13, %s143_s19  ;;  %85 = vrot.lane.b32.xlu1 %v114_v14, %s144_s20 }
  0x1e   :  { %91 = vrot.lane.b32.xlu0 %v115_v15, %s145_s0 }
  0x74   :  { %v8_v16 = vpop.permute.xlu0 %7   ;;  %v20_v17 = vpop.permute.xlu1 %19  }
  0x75   :  { %10 = vst.msk [vmem:[#allocation0] sm:$0x1] %vm9_vm1, %v8_v16  }
  0x78   :  { %v14_v18 = vpop.permute.xlu0 %13   ;;  %v26_v19 = vpop.permute.xlu1 %25  }
  0x79   :  { %16 = vst.msk [vmem:[#allocation0] sm:$0x1] %vm15_vm2, %v14_v18  }
  0x7a   :  { %22 = vst.msk [vmem:[#allocation0] sm:$0x1] %vm21_vm3, %v20_v17  }
  0x7b   :  { %28 = vst.msk [vmem:[#allocation0] sm:$0x1] %vm27_vm4, %v26_v19  }
  0x7c   :  { %v32_v20 = vpop.permute.xlu0 %31   ;;  %v38_v21 = vpop.permute.xlu1 %37  }
  0x7d   :  { %34 = vst.msk [vmem:[#allocation0] sm:$0x1] %vm33_vm5, %v32_v20  }
  0x7e   :  { %40 = vst.msk [vmem:[#allocation0] sm:$0x1] %vm39_vm6, %v38_v21  }
  0x80   :  { %v44_v22 = vpop.permute.xlu0 %43   ;;  %v50_v23 = vpop.permute.xlu1 %49  }
  0x81   :  { %46 = vst.msk [vmem:[#allocation0] sm:$0x1] %vm45_vm7, %v44_v22  }
  0x82   :  { %52 = vst.msk [vmem:[#allocation0] sm:$0x1] %vm51_vm8, %v50_v23  }
  0x84   :  { %v56_v24 = vpop.permute.xlu0 %55   ;;  %v62_v25 = vpop.permute.xlu1 %61  }
  0x85   :  { %58 = vst.msk [vmem:[#allocation0] sm:$0x1] %vm57_vm9, %v56_v24  }
  0x86   :  { %64 = vst.msk [vmem:[#allocation0] sm:$0x1] %vm63_vm10, %v62_v25  }
  0x88   :  { %v68_v26 = vpop.permute.xlu0 %67   ;;  %v74_v27 = vpop.permute.xlu1 %73  }
  0x89   :  { %70 = vst.msk [vmem:[#allocation0] sm:$0x1] %vm69_vm11, %v68_v26  }
  0x8a   :  { %76 = vst.msk [vmem:[#allocation0] sm:$0x1] %vm75_vm12, %v74_v27  }
  0x8c   :  { %v80_v28 = vpop.permute.xlu0 %79   ;;  %v86_v29 = vpop.permute.xlu1 %85  }
  0x8d   :  { %82 = vst.msk [vmem:[#allocation0] sm:$0x1] %vm81_vm13, %v80_v28  }
  0x8e   :  { %88 = vst.msk [vmem:[#allocation0] sm:$0x1] %vm87_vm14, %v86_v29  }
  0x90   :  { %v92_v30 = vpop.permute.xlu0 %91  }
  0x91   :  { %94 = vst.msk [vmem:[#allocation0] sm:$0x1] %vm93_vm15, %v92_v30  }
  0x98   :  { %v98_v31 = vld [vmem:[#allocation0] sm:$0x1] }
  0x99   :  { %100 = vst [vmem:[%s208_s1] sm:$0x1] %v98_v31 }

// kernel: tile.28
= control target key start
LH: loop header
LB: loop body
LE: loop exit
PB: predicated region body
PF: predicated region fallthrough
CT: control target
= control target key end

     0   :  { %s40_s0 = inlined_call_operand.vmem [shape: f32[4], index: 0, kind: input, shape index: {}]   ;;  %s41_s1 = inlined_call_operand.vmem [shape: f32[32,4], index: 1, kind: output, shape index: {}]  }
   0x1   :  { %v4_v0 = vld [vmem:[%s40_s0] ss:$0 sm:$0xff] }
   0x2   :  { %5 = vst [vmem:[%s41_s1] sm:$0xff] %v4_v0  ;;  %12 = vst [vmem:[%s41_s1 + $0x8] sm:$0xff] %v4_v0 }
   0x3   :  { %13 = vst [vmem:[%s41_s1 + $0x10] sm:$0xff] %v4_v0  ;;  %14 = vst [vmem:[%s41_s1 + $0x18] sm:$0xff] %v4_v0 }

// kernel: tile.29
= control target key start
LH: loop header
LB: loop body
LE: loop exit
PB: predicated region body
PF: predicated region fallthrough
CT: control target
= control target key end

     0   :  { %s259_s10 = smov 124   ;;  %s260_s11 = smov 116   ;;  %vm3_vm0 = vcmask 31744   ;;  %vm9_vm1 = vcmask 1048544   ;;  %vm15_vm2 = vcmask 1015744   ;;  %vm21_vm3 = vcmask 982944   ;;  %s399_s0 = inlined_call_operand.vmem [shape: f32[32,4], index: 0, kind: input, shape index: {}]   ;;  %s400_s1 = inlined_call_operand.vmem [shape: f32[1,128], index: 1, kind: output, shape index: {}]  }
   0x1   :  { %v197_v0 = vld [vmem:[%s399_s0 + $0x1f] sm:$0x1]   ;;  %v199_v1 = vld [vmem:[%s399_s0 + $0x1d] sm:$0x1]   ;;  %v198_v2 = vld [vmem:[%s399_s0 + $0x1e] sm:$0x1]  }
   0x2   :  { %7 = vrot.lane.b32.xlu0 %v197_v0, %s259_s10  ;;  %19 = vrot.lane.b32.xlu1 %v199_v1, %s260_s11  ;;  %v200_v3 = vld [vmem:[%s399_s0 + $0x1c] sm:$0x1]   ;;  %s261_s16 = smov 120   ;;  %s262_s17 = smov 112   ;;  %v201_v4 = vld [vmem:[%s399_s0 + $0x1b] sm:$0x1]  }
   0x3   :  { %v202_v5 = vld [vmem:[%s399_s0 + $0x1a] sm:$0x1]   ;;  %s263_s22 = smov 108   ;;  %s264_s23 = smov 104   ;;  %v203_v6 = vld [vmem:[%s399_s0 + $0x19] sm:$0x1]  }
   0x4   :  { %v204_v7 = vld [vmem:[%s399_s0 + $0x18] sm:$0x1]   ;;  %s265_s28 = smov 100   ;;  %s266_s29 = smov 96   ;;  %v205_v8 = vld [vmem:[%s399_s0 + $0x17] sm:$0x1]  }
   0x5   :  { %v206_v9 = vld [vmem:[%s399_s0 + $0x16] sm:$0x1]   ;;  %v2_v10 = vld [vmem:[%s399_s0] sm:$0x1]   ;;  %s267_s7 = smov 92   ;;  %s268_s8 = smov 88  }
   0x6   :  { %13 = vrot.lane.b32.xlu0 %v198_v2, %s261_s16  ;;  %25 = vrot.lane.b32.xlu1 %v200_v3, %s262_s17  ;;  %4 = vst.msk [vmem:[#allocation0] sm:$0x1] %vm3_vm0, %v2_v10   ;;  %v207_v11 = vld [vmem:[%s399_s0 + $0x15] sm:$0x1]   ;;  %v208_v12 = vld [vmem:[%s399_s0 + $0x14] sm:$0x1]  }
   0x7   :  { %s269_s13 = smov 84   ;;  %s270_s14 = smov 80   ;;  %v209_v13 = vld [vmem:[%s399_s0 + $0x13] sm:$0x1]   ;;  %v210_v14 = vld [vmem:[%s399_s0 + $0x12] sm:$0x1]  }
   0x8   :  { %s271_s19 = smov 76   ;;  %s272_s20 = smov 72   ;;  %v211_v15 = vld [vmem:[%s399_s0 + $0x11] sm:$0x1]   ;;  %v212_v16 = vld [vmem:[%s399_s0 + $0x10] sm:$0x1]  }
   0x9   :  { %s273_s25 = smov 68   ;;  %s274_s26 = smov 64   ;;  %v213_v17 = vld [vmem:[%s399_s0 + $0xf] sm:$0x1]   ;;  %v214_v18 = vld [vmem:[%s399_s0 + $0xe] sm:$0x1]  }
   0xa   :  { %31 = vrot.lane.b32.xlu0 %v201_v4, %s263_s22  ;;  %37 = vrot.lane.b32.xlu1 %v202_v5, %s264_s23  ;;  %s275_s2 = smov 60   ;;  %s276_s3 = smov 56   ;;  %v215_v19 = vld [vmem:[%s399_s0 + $0xd] sm:$0x1]   ;;  %v216_v20 = vld [vmem:[%s399_s0 + $0xc] sm:$0x1]  }
   0xb   :  { %s278_s9 = smov 48   ;;  %v217_v21 = vld [vmem:[%s399_s0 + $0xb] sm:$0x1]   ;;  %v218_v22 = vld [vmem:[%s399_s0 + $0xa] sm:$0x1]   ;;  %s280_s15 = smov 40  }
   0xc   :  { %v219_v23 = vld [vmem:[%s399_s0 + $0x9] sm:$0x1]   ;;  %v220_v24 = vld [vmem:[%s399_s0 + $0x8] sm:$0x1]   ;;  %s282_s21 = smov 32   ;;  %s284_s27 = smov 24  }
   0xd   :  { %v221_v25 = vld [vmem:[%s399_s0 + $0x7] sm:$0x1]   ;;  %v222_v26 = vld [vmem:[%s399_s0 + $0x6] sm:$0x1]   ;;  %v223_v27 = vld [vmem:[%s399_s0 + $0x5] sm:$0x1]  }
   0xe   :  { %43 = vrot.lane.b32.xlu0 %v203_v6, %s265_s28  ;;  %49 = vrot.lane.b32.xlu1 %v204_v7, %s266_s29  ;;  %v224_v28 = vld [vmem:[%s399_s0 + $0x4] sm:$0x1]   ;;  %s286_s4 = smov 16   ;;  %v225_v29 = vld [vmem:[%s399_s0 + $0x3] sm:$0x1]   ;;  %s288_s10 = smov 8  }
   0xf   :  { %v226_v30 = vld [vmem:[%s399_s0 + $0x2] sm:$0x1]   ;;  %v227_v31 = vld [vmem:[%s399_s0 + $0x1] sm:$0x1]   ;;  %s289_s0 = smov 4   ;;  %vm27_vm4 = vcmask 950144  }
  0x10   :  { %vm33_vm5 = vcmask 917344   ;;  %vm39_vm6 = vcmask 884544   ;;  %vm45_vm7 = vcmask 851744   ;;  %vm51_vm8 = vcmask 818944  }
  0x11   :  { %vm57_vm9 = vcmask 786144   ;;  %vm63_vm10 = vcmask 753344   ;;  %vm69_vm11 = vcmask 720544   ;;  %vm75_vm12 = vcmask 687744  }
  0x12   :  { %55 = vrot.lane.b32.xlu0 %v205_v8, %s267_s7  ;;  %61 = vrot.lane.b32.xlu1 %v206_v9, %s268_s8  ;;  %s277_s8 = smov 52   ;;  %vm81_vm13 = vcmask 654944   ;;  %vm87_vm14 = vcmask 622144   ;;  %vm93_vm15 = vcmask 589344   ;;  %vm99_vm0 = vcmask 556544  }
  0x16   :  { %67 = vrot.lane.b32.xlu0 %v207_v11, %s269_s13  ;;  %73 = vrot.lane.b32.xlu1 %v208_v12, %s270_s14  ;;  %s279_s14 = smov 44  }
  0x1a   :  { %79 = vrot.lane.b32.xlu0 %v209_v13, %s271_s19  ;;  %85 = vrot.lane.b32.xlu1 %v210_v14, %s272_s20  ;;  %s281_s20 = smov 36  }
  0x1e   :  { %91 = vrot.lane.b32.xlu0 %v211_v15, %s273_s25  ;;  %97 = vrot.lane.b32.xlu1 %v212_v16, %s274_s26  ;;  %s283_s26 = smov 28  }
  0x22   :  { %103 = vrot.lane.b32.xlu0 %v213_v17, %s275_s2  ;;  %109 = vrot.lane.b32.xlu1 %v214_v18, %s276_s3  ;;  %s285_s3 = smov 20  }
  0x26   :  { %115 = vrot.lane.b32.xlu0 %v215_v19, %s277_s8  ;;  %121 = vrot.lane.b32.xlu1 %v216_v20, %s278_s9  ;;  %s287_s9 = smov 12  }
  0x2a   :  { %127 = vrot.lane.b32.xlu0 %v217_v21, %s279_s14  ;;  %133 = vrot.lane.b32.xlu1 %v218_v22, %s280_s15 }
  0x2e   :  { %139 = vrot.lane.b32.xlu0 %v219_v23, %s281_s20  ;;  %145 = vrot.lane.b32.xlu1 %v220_v24, %s282_s21 }
  0x32   :  { %151 = vrot.lane.b32.xlu0 %v221_v25, %s283_s26  ;;  %157 = vrot.lane.b32.xlu1 %v222_v26, %s284_s27 }
  0x36   :  { %163 = vrot.lane.b32.xlu0 %v223_v27, %s285_s3  ;;  %169 = vrot.lane.b32.xlu1 %v224_v28, %s286_s4 }
  0x3a   :  { %175 = vrot.lane.b32.xlu0 %v225_v29, %s287_s9  ;;  %181 = vrot.lane.b32.xlu1 %v226_v30, %s288_s10 }
  0x3e   :  { %187 = vrot.lane.b32.xlu0 %v227_v31, %s289_s0 }
  0x74   :  { %v8_v32 = vpop.permute.xlu0 %7   ;;  %v20_v33 = vpop.permute.xlu1 %19  }
  0x75   :  { %10 = vst.msk [vmem:[#allocation0] sm:$0x1] %vm9_vm1, %v8_v32   ;;  %vm105_vm1 = vcmask 523744  }
  0x78   :  { %v14_v34 = vpop.permute.xlu0 %13   ;;  %v26_v35 = vpop.permute.xlu1 %25  }
  0x79   :  { %16 = vst.msk [vmem:[#allocation0] sm:$0x1] %vm15_vm2, %v14_v34   ;;  %vm111_vm2 = vcmask 490944  }
  0x7a   :  { %22 = vst.msk [vmem:[#allocation0] sm:$0x1] %vm21_vm3, %v20_v33   ;;  %vm117_vm3 = vcmask 458144  }
  0x7b   :  { %28 = vst.msk [vmem:[#allocation0] sm:$0x1] %vm27_vm4, %v26_v35   ;;  %vm123_vm4 = vcmask 425344  }
  0x7c   :  { %v32_v36 = vpop.permute.xlu0 %31   ;;  %v38_v37 = vpop.permute.xlu1 %37  }
  0x7d   :  { %34 = vst.msk [vmem:[#allocation0] sm:$0x1] %vm33_vm5, %v32_v36   ;;  %vm129_vm5 = vcmask 392544  }
  0x7e   :  { %40 = vst.msk [vmem:[#allocation0] sm:$0x1] %vm39_vm6, %v38_v37   ;;  %vm135_vm6 = vcmask 359744  }
  0x80   :  { %v44_v38 = vpop.permute.xlu0 %43   ;;  %v50_v39 = vpop.permute.xlu1 %49  }
  0x81   :  { %46 = vst.msk [vmem:[#allocation0] sm:$0x1] %vm45_vm7, %v44_v38   ;;  %vm141_vm7 = vcmask 326944  }
  0x82   :  { %52 = vst.msk [vmem:[#allocation0] sm:$0x1] %vm51_vm8, %v50_v39   ;;  %vm147_vm8 = vcmask 294144  }
  0x84   :  { %v56_v40 = vpop.permute.xlu0 %55   ;;  %v62_v41 = vpop.permute.xlu1 %61  }
  0x85   :  { %58 = vst.msk [vmem:[#allocation0] sm:$0x1] %vm57_vm9, %v56_v40   ;;  %vm153_vm9 = vcmask 261344  }
  0x86   :  { %64 = vst.msk [vmem:[#allocation0] sm:$0x1] %vm63_vm10, %v62_v41   ;;  %vm159_vm10 = vcmask 228544  }
  0x88   :  { %v68_v42 = vpop.permute.xlu0 %67   ;;  %v74_v43 = vpop.permute.xlu1 %73  }
  0x89   :  { %70 = vst.msk [vmem:[#allocation0] sm:$0x1] %vm69_vm11, %v68_v42   ;;  %vm165_vm11 = vcmask 195744  }
  0x8a   :  { %76 = vst.msk [vmem:[#allocation0] sm:$0x1] %vm75_vm12, %v74_v43   ;;  %vm171_vm12 = vcmask 162944  }
  0x8c   :  { %v80_v44 = vpop.permute.xlu0 %79   ;;  %v86_v45 = vpop.permute.xlu1 %85  }
  0x8d   :  { %82 = vst.msk [vmem:[#allocation0] sm:$0x1] %vm81_vm13, %v80_v44   ;;  %vm177_vm13 = vcmask 130144  }
  0x8e   :  { %88 = vst.msk [vmem:[#allocation0] sm:$0x1] %vm87_vm14, %v86_v45   ;;  %vm183_vm14 = vcmask 97344  }
  0x90   :  { %v92_v46 = vpop.permute.xlu0 %91   ;;  %v98_v47 = vpop.permute.xlu1 %97  }
  0x91   :  { %94 = vst.msk [vmem:[#allocation0] sm:$0x1] %vm93_vm15, %v92_v46   ;;  %vm189_vm15 = vcmask 64544  }
  0x92   :  { %100 = vst.msk [vmem:[#allocation0] sm:$0x1] %vm99_vm0, %v98_v47  }
  0x94   :  { %v104_v48 = vpop.permute.xlu0 %103   ;;  %v110_v49 = vpop.permute.xlu1 %109  }
  0x95   :  { %106 = vst.msk [vmem:[#allocation0] sm:$0x1] %vm105_vm1, %v104_v48  }
  0x96   :  { %112 = vst.msk [vmem:[#allocation0] sm:$0x1] %vm111_vm2, %v110_v49  }
  0x98   :  { %v116_v50 = vpop.permute.xlu0 %115   ;;  %v122_v51 = vpop.permute.xlu1 %121  }
  0x99   :  { %118 = vst.msk [vmem:[#allocation0] sm:$0x1] %vm117_vm3, %v116_v50  }
  0x9a   :  { %124 = vst.msk [vmem:[#allocation0] sm:$0x1] %vm123_vm4, %v122_v51  }
  0x9c   :  { %v128_v52 = vpop.permute.xlu0 %127   ;;  %v134_v53 = vpop.permute.xlu1 %133  }
  0x9d   :  { %130 = vst.msk [vmem:[#allocation0] sm:$0x1] %vm129_vm5, %v128_v52  }
  0x9e   :  { %136 = vst.msk [vmem:[#allocation0] sm:$0x1] %vm135_vm6, %v134_v53  }
  0xa0   :  { %v140_v54 = vpop.permute.xlu0 %139   ;;  %v146_v55 = vpop.permute.xlu1 %145  }
  0xa1   :  { %142 = vst.msk [vmem:[#allocation0] sm:$0x1] %vm141_vm7, %v140_v54  }
  0xa2   :  { %148 = vst.msk [vmem:[#allocation0] sm:$0x1] %vm147_vm8, %v146_v55  }
  0xa4   :  { %v152_v56 = vpop.permute.xlu0 %151   ;;  %v158_v57 = vpop.permute.xlu1 %157  }
  0xa5   :  { %154 = vst.msk [vmem:[#allocation0] sm:$0x1] %vm153_vm9, %v152_v56  }
  0xa6   :  { %160 = vst.msk [vmem:[#allocation0] sm:$0x1] %vm159_vm10, %v158_v57  }
  0xa8   :  { %v164_v58 = vpop.permute.xlu0 %163   ;;  %v170_v59 = vpop.permute.xlu1 %169  }
  0xa9   :  { %166 = vst.msk [vmem:[#allocation0] sm:$0x1] %vm165_vm11, %v164_v58  }
  0xaa   :  { %172 = vst.msk [vmem:[#allocation0] sm:$0x1] %vm171_vm12, %v170_v59  }
  0xac   :  { %v176_v60 = vpop.permute.xlu0 %175   ;;  %v182_v61 = vpop.permute.xlu1 %181  }
  0xad   :  { %178 = vst.msk [vmem:[#allocation0] sm:$0x1] %vm177_vm13, %v176_v60  }
  0xae   :  { %184 = vst.msk [vmem:[#allocation0] sm:$0x1] %vm183_vm14, %v182_v61  }
  0xb0   :  { %v188_v62 = vpop.permute.xlu0 %187  }
  0xb1   :  { %190 = vst.msk [vmem:[#allocation0] sm:$0x1] %vm189_vm15, %v188_v62  }
  0xb8   :  { %v194_v63 = vld [vmem:[#allocation0] sm:$0x1] }
  0xb9   :  { %196 = vst [vmem:[%s400_s1] sm:$0x1] %v194_v63 }

// kernel: decoder_step_forward.1
= control target key start
LH: loop header
LB: loop body
LE: loop exit
PB: predicated region body
PF: predicated region fallthrough
CT: control target
= control target key end

     0   :  { %s2399_s17 = smov 0   ;;  %s2851_s0 = inlined_call_operand.vmem [shape: f32[2,8,64], index: 0, kind: input, shape index: {}]   ;;  %s2852_s1 = inlined_call_operand.vmem [shape: f32[2,16,64], index: 1, kind: input, shape index: {}]   ;;  %s2853_s2 = inlined_call_operand.vmem [shape: f32[64,128], index: 2, kind: input, shape index: {}]   ;;  %s2854_s3 = inlined_call_operand.vmem [shape: f32[1,128], index: 3, kind: input, shape index: {}]   ;;  %s2855_s4 = inlined_call_operand.vmem [shape: f32[3,72,64], index: 4, kind: input, shape index: {}]   ;;  %s2856_s5 = inlined_call_operand.vmem [shape: f32[3,72,64], index: 5, kind: input, shape index: {}]   ;;  %s2857_s6 = inlined_call_operand.vmem [shape: f32[1,64], index: 6, kind: input, shape index: {}]   ;;  %s2858_s7 = inlined_call_operand.vmem [shape: f32[1,64], index: 7, kind: input, shape index: {}]   ;;  %s2859_s8 = inlined_call_operand.vmem [shape: f32[3,72,64], index: 8, kind: input, shape index: {}]   ;;  %s2860_s9 = inlined_call_operand.vmem [shape: f32[1,64], index: 9, kind: input, shape index: {}]   ;;  %s2861_s10 = inlined_call_operand.vmem [shape: f32[1,64], index: 10, kind: input, shape index: {}]   ;;  %s2862_s11 = inlined_call_operand.vmem [shape: f32[2,16,64], index: 11, kind: output, shape index: {}]  }
   0x1 LB: > { %s1731_s18 = sadd.s32 4294967295, %s2330_s17   ;;  %p1735_p0 = scmp.ge.s32.totalorder %s2330_s17, 1  ;;  %s2330_s17 = sphi %s2399_s17, %s21_s17  }
   0x2   : > { %p346_p1 = scmp.lt.s32.totalorder %s2330_s17, 3 }
   0x4   : > { %p347_p2 = pnand %p1735_p0, %p346_p1 }
   0x5   : > { %v435_v0 = vld [vmem:[%s2853_s2] sm:$0xff] (!%p347_p2)  ;;  %v436_v1 = vld [vmem:[%s2853_s2 + $0x8] sm:$0xff] (!%p347_p2)  ;;  %v437_v2 = vld [vmem:[%s2853_s2 + $0x10] sm:$0xff] (!%p347_p2)  ;;  %v2332_v3 = vmov (!%p347_p2), 0.0|0.0   ;;  %vm2333_vm0 = vmmov (!%p347_p2), 0   ;;  %v2334_v6 = vmov (!%p347_p2), 0.0   ;;  %v529_v45 = vlaneseq (!%p347_p2) }
   0x6   : > { %350 = sbr.rel (%p347_p2) target bundleno = 1044 (0x414), region = 64  ;;  %2139 = vmatprep.subr.bf16.mxu0 (!%p347_p2), %v2332_v3  ;;  %v2140_v4 = vpack.c.bf16 (!%p347_p2), %v436_v1, %v435_v0  ;;  %v438_v5 = vld [vmem:[%s2853_s2 + $0x18] sm:$0xff] (!%p347_p2)  ;;  %1947 = vmatprep.mubr.msk.f32.mxu0 (!%p347_p2), %vm2333_vm0, %v2334_v6  ;;  %p390_p3 = scmp.lt.s32.totalorder (!%p347_p2), %s1731_s18, 1  ;;  %v439_v8 = vld [vmem:[%s2853_s2 + $0x20] sm:$0xff] (!%p347_p2)  ;;  %v440_v9 = vld [vmem:[%s2853_s2 + $0x28] sm:$0xff] (!%p347_p2)  ;;  %vm450_vm1 = vcmask (!%p347_p2), 523264  }
   0x7   : > { %v2143_v7 = vpack.c.bf16 (!%p347_p2), %v438_v5, %v437_v2  ;;  %v2146_v10 = vpack.c.bf16 (!%p347_p2), %v440_v9, %v439_v8  ;;  %v441_v12 = vld [vmem:[%s2853_s2 + $0x30] sm:$0xff] (!%p347_p2)  ;;  %v442_v13 = vld [vmem:[%s2853_s2 + $0x38] sm:$0xff] (!%p347_p2)  ;;  %s2335_s22 = smov (!%p347_p2), 4   ;;  %v684_v17 = vld [vmem:[%s2855_s4] sm:$0xff] (!%p347_p2)  ;;  %vm404_vm2 = vcmask (!%p347_p2), 588800   ;;  %vm431_vm3 = vcmask (!%p347_p2), 556064  }
   0x8   : > { %2141 = vmatpush3.bf16.msra.mxu0 (!%p347_p2), %v2140_v4  ;;  %v2149_v15 = vpack.c.bf16 (!%p347_p2), %v442_v13, %v441_v12  ;;  %v685_v18 = vld [vmem:[%s2855_s4 + $0x8] sm:$0xff] (!%p347_p2)  ;;  %v686_v19 = vld [vmem:[%s2855_s4 + $0x10] sm:$0xff] (!%p347_p2)  ;;  %vm407_vm4 = vcmask (!%p347_p2), 582656   ;;  %v687_v22 = vld [vmem:[%s2855_s4 + $0x18] sm:$0xff] (!%p347_p2)  ;;  %405 = vst.msk [vmem:[#allocation2] sm:$0xff] (!%p347_p2), %vm404_vm2, %v2334_v6  ;;  %v2510_v47 = vshrl.u32 (!%p347_p2), %v529_v45, 7 }
   0x9   : > { %2142 = vmatprep.subr.bf16.mxu0 (!%p347_p2), %v2332_v3  ;;  %v2167_v21 = vpack.c.bf16 (!%p347_p2), %v685_v18, %v684_v17  ;;  %406 = vst.msk [vmem:[#allocation2 + $0x8] sm:$0xff] (!%p347_p2), %vm404_vm2, %v2334_v6  ;;  %418 = vst.msk [vmem:[#allocation4] sm:$0xff] (!%p347_p2), %vm404_vm2, %v2334_v6  ;;  %v2171_v23 = vpack.c.bf16 (!%p347_p2), %v687_v22, %v686_v19  ;;  %v688_v24 = vld [vmem:[%s2855_s4 + $0x20] sm:$0xff] (!%p347_p2)  ;;  %v689_v25 = vld [vmem:[%s2855_s4 + $0x28] sm:$0xff] (!%p347_p2)  ;;  %v2336_v43 = vmov (!%p347_p2), 1966171168  }
   0xa   : > { %419 = vst.msk [vmem:[#allocation4 + $0x8] sm:$0xff] (!%p347_p2), %vm404_vm2, %v2334_v6  ;;  %v2175_v27 = vpack.c.bf16 (!%p347_p2), %v689_v25, %v688_v24  ;;  %v690_v28 = vld [vmem:[%s2855_s4 + $0x30] sm:$0xff] (!%p347_p2)  ;;  %v691_v29 = vld [vmem:[%s2855_s4 + $0x38] sm:$0xff] (!%p347_p2)  ;;  %v692_v32 = vld [vmem:[%s2855_s4 + $0x40] sm:$0xff] (!%p347_p2)  ;;  %v527_v44 = vunpack.c.l.s4 (!%p347_p2), %v2336_v43  ;;  %vm915_vm5 = vcmask (!%p347_p2), 1046528   ;;  %v2527_v1 = vsub.s32 (!%p347_p2), 0, %v2510_v47 }
   0xb   : > { %408 = vst.msk [vmem:[#allocation2 + $0x10] sm:$0x3] (!%p347_p2), %vm407_vm4, %v2334_v6  ;;  %409 = vst.msk [vmem:[#allocation3] sm:$0x3] (!%p347_p2), %vm407_vm4, %v2334_v6  ;;  %2168 = vmatprep.subr.bf16.mxu1 (!%p347_p2), %v2167_v21  ;;  %v2179_v30 = vpack.c.bf16 (!%p347_p2), %v691_v29, %v690_v28  ;;  %v1747_v33 = vld [vmem:[%s2855_s4 + $0x48] sm:$0xff] (!%p347_p2)  ;;  %v1748_v34 = vld [vmem:[%s2855_s4 + $0x50] sm:$0xff] (!%p347_p2) }
   0xc   : > { %2144 = vmatpush3.bf16.msra.mxu0 (!%p347_p2), %v2143_v7  ;;  %410 = vst.msk [vmem:[#allocation3 + $0x2] sm:$0x3] (!%p347_p2), %vm407_vm4, %v2334_v6  ;;  %411 = vst.msk [vmem:[#allocation3 + $0x4] sm:$0x3] (!%p347_p2), %vm407_vm4, %v2334_v6  ;;  %2170 = vmatpush3.bf16.msra.mxu1 (!%p347_p2), %v2167_v21  ;;  %v1749_v35 = vld [vmem:[%s2855_s4 + $0x58] sm:$0xff] (!%p347_p2)  ;;  %v1750_v36 = vld [vmem:[%s2855_s4 + $0x60] sm:$0xff] (!%p347_p2)  ;;  %v2183_v37 = vpack.c.bf16 (!%p347_p2), %v1748_v34, %v1747_v33  ;;  %v528_v46 = vunpack.c.0.s8 (!%p347_p2), %v527_v44 }
   0xd   : > { %s2864_s18 = smov (!%p390_p3, %s1731_s18), 1  ;;  %2145 = vmatprep.subr.bf16.mxu0 %v2332_v3  ;;  %412 = vst.msk [vmem:[#allocation3 + $0x6] sm:$0x3] %vm407_vm4, %v2334_v6  ;;  %413 = vst.msk [vmem:[#allocation3 + $0x8] sm:$0x3] %vm407_vm4, %v2334_v6  ;;  %2172 = vmatprep.subr.bf16.mxu1 %v2171_v23  ;;  %v2187_v39 = vpack.c.bf16 %v1750_v36, %v1749_v35  ;;  %v1751_v40 = vld [vmem:[%s2855_s4 + $0x68] sm:$0xff] }
   0xe   : > { %s1821_s12 = sshll.u32 %s2864_s18, 4  ;;  %s1736_s23 = sshll.u32 %s2864_s18, 3  ;;  %414 = vst.msk [vmem:[#allocation3 + $0xa] sm:$0x3] %vm407_vm4, %v2334_v6  ;;  %415 = vst.msk [vmem:[#allocation3 + $0xc] sm:$0x3] %vm407_vm4, %v2334_v6  ;;  %v531_v54 = vsub.s32 %v528_v46, %v2510_v47 }
   0xf   : > { %s398_s15 = scalar_lea.vmem %s2852_s1, %s1821_s12  ;;  %s393_s26 = scalar_lea.vmem %s2851_s0, %s1736_s23  ;;  %416 = vst.msk [vmem:[#allocation3 + $0xe] sm:$0x3] %vm407_vm4, %v2334_v6  ;;  %417 = vst.msk [vmem:[#allocation3 + $0x10] sm:$0x3] %vm407_vm4, %v2334_v6  ;;  %v1752_v41 = vld [vmem:[%s2855_s4 + $0x70] sm:$0xff]  ;;  %v1753_v48 = vld [vmem:[%s2855_s4 + $0x78] sm:$0xff] }
  0x10   : > { %v421_v11 = vld [vmem:[%s398_s15] sm:$0xff]  ;;  %v422_v14 = vld [vmem:[%s398_s15 + $0x8] sm:$0xff]  ;;  %2147 = vmatpush3.bf16.msra.mxu0 %v2146_v10  ;;  %420 = vst.msk [vmem:[#allocation4 + $0x10] sm:$0x3] %vm407_vm4, %v2334_v6  ;;  %2174 = vmatpush3.bf16.msra.mxu1 %v2171_v23  ;;  %v2191_v42 = vpack.c.bf16 %v1752_v41, %v1751_v40  ;;  %vm1116_vm6 = vcmask 1045504   ;;  %s2337_s19 = smov 68   ;;  %s403_s20 = scalar_lea.vmem %s2862_s11, %s1821_s12 }
  0x11   : > { %425 = vrot.lane.b32.xlu0 %v421_v11, %s2335_s22  ;;  %2148 = vmatprep.subr.bf16.mxu0 %v2332_v3  ;;  %v434_v16 = vld [vmem:[%s393_s26] sm:$0xff]  ;;  %v1755_v58 = vld [vmem:[%s2855_s4 + $0x88] sm:$0xff]  ;;  %v1759_v25 = vld [vmem:[%s2856_s5 + $0x50] sm:$0xff]  ;;  %vm630_vm7 = vcmask 548896  }
  0x12   : > { %2176 = vmatprep.subr.bf16.mxu1 %v2175_v27  ;;  %v1754_v49 = vld [vmem:[%s2855_s4 + $0x80] sm:$0xff]  ;;  %v1758_v24 = vld [vmem:[%s2856_s5 + $0x48] sm:$0xff]  ;;  %v696_v28 = vld [vmem:[%s2856_s5 + $0x18] sm:$0xff] }
  0x13   : > { %v2195_v50 = vpack.c.bf16 %v1754_v49, %v1753_v48  ;;  %v1741_v53 = vld [vmem:[%s2854_s3] ss:$0 sm:$0xff]  ;;  %v698_v36 = vld [vmem:[%s2856_s5 + $0x28] sm:$0xff]  ;;  %v1763_v41 = vld [vmem:[%s2856_s5 + $0x70] sm:$0xff] }
  0x14   : > { %2150 = vmatpush3.bf16.msra.mxu0 %v2149_v15  ;;  %2178 = vmatpush3.bf16.msra.mxu1 %v2175_v27  ;;  %v693_v19 = vld [vmem:[%s2856_s5] sm:$0xff]  ;;  %v695_v27 = vld [vmem:[%s2856_s5 + $0x10] sm:$0xff]  ;;  %v1762_v40 = vld [vmem:[%s2856_s5 + $0x68] sm:$0xff] }
  0x15   : > { %427 = vrot.lane.b32.xlu0 %v422_v14, %s2335_s22  ;;  %2180 = vmatprep.subr.bf16.mxu1 %v2179_v30  ;;  %v1761_v33 = vld [vmem:[%s2856_s5 + $0x60] sm:$0xff]  ;;  %v2207_v43 = vpack.c.bf16 %v1763_v41, %v1762_v40  ;;  %v700_v44 = vld [vmem:[%s2856_s5 + $0x38] sm:$0xff]  ;;  %v1773_v41 = vld [vmem:[%s2855_s4 + $0xb0] sm:$0xff] }
  0x16   : > { %v697_v35 = vld [vmem:[%s2856_s5 + $0x20] sm:$0xff]  ;;  %v1764_v45 = vld [vmem:[%s2856_s5 + $0x78] sm:$0xff] }
  0x17   : > { %1948 = vmatmul.mubr.msk.f32.vlgmr.msra.gmra.mrb[0].mxu0 %vm450_vm1, %v434_v16  ;;  %v1765_v48 = vld [vmem:[%s2856_s5 + $0x80] sm:$0xff] }
  0x18   : > { %2182 = vmatpush3.bf16.msra.mxu1 %v2179_v30 }
  0x19   : > { %1987 = vmatprep.subr.mxu1 %v692_v32 }
  0x1c   : > { %1988 = vmatpush3.msra.mxu1 %v692_v32  ;;  %v1760_v32 = vld [vmem:[%s2856_s5 + $0x58] sm:$0xff] }
  0x1d   : > { %2184 = vmatprep.subr.bf16.mxu1 %v2183_v37  ;;  %v2203_v34 = vpack.c.bf16 %v1761_v33, %v1760_v32  ;;  %v1771_v33 = vld [vmem:[%s2855_s4 + $0xa0] sm:$0xff] }
  0x83   : > { %v426_v20 = vpop.permute.xlu0 %425 }
  0x84   : > { %432 = vst.msk [vmem:[#allocation2 + $0x1] sm:$0xff] %vm431_vm3, %v426_v20  ;;  %v694_v20 = vld [vmem:[%s2856_s5 + $0x8] sm:$0xff] }
  0x85   : > { %v2151_v23 = vpack.c.bf16 %v694_v20, %v693_v19 }
  0x87   : > { %v428_v26 = vpop.permute.xlu0 %427  ;;  %2152 = vmatprep.subr.bf16.mxu0 %v2151_v23 }
  0x88   : > { %433 = vst.msk [vmem:[#allocation2 + $0x9] sm:$0xff] %vm431_vm3, %v428_v26  ;;  %v2199_v26 = vpack.c.bf16 %v1759_v25, %v1758_v24  ;;  %2154 = vmatpush3.bf16.msra.mxu0 %v2151_v23 }
  0x8b   : > { %v681_v31 = vld [vmem:[#allocation2] sm:$0xff] }
  0x8c   : > { %1989 = vmatprep.mubr.msk.f32.mxu1 %vm404_vm2, %v681_v31  ;;  %v916_v51 = vrot.slane %v681_v31, 1  ;;  %v1117_v55 = vrot.slane %v681_v31, 2  ;;  %v2155_v31 = vpack.c.bf16 %v696_v28, %v695_v27 }
  0x8e   : > { %2156 = vmatprep.subr.bf16.mxu0 %v2155_v31 }
  0x8f   : > { %v682_v38 = vld [vmem:[#allocation2 + $0x8] sm:$0xff]  ;;  %v683_v59 = vld [vmem:[#allocation2 + $0x10] sm:$0x3]  ;;  %2158 = vmatpush3.bf16.msra.mxu0 %v2155_v31 }
  0x90   : > { %1990 = vmatmul.mubr.msk.f32.vlgmr.msra.gmra.mrb[0].mxu1 %vm404_vm2, %v682_v38  ;;  %v917_v52 = vrot.slane %v682_v38, 1  ;;  %v1118_v56 = vrot.slane %v682_v38, 2  ;;  %v919_v63 = vrot.slane %v683_v59, 1  ;;  %v1120_v0 = vrot.slane %v683_v59, 2 }
  0x91   : > { %2186 = vmatpush3.bf16.msra.mxu1 %v2183_v37 }
  0x92   : > { %2188 = vmatprep.subr.bf16.mxu1 %v2187_v39  ;;  %v918_v62 = vsel %vm915_vm5, %v916_v51, %v917_v52  ;;  %v920_v4 = vsel %vm915_vm5, %v917_v52, %v919_v63  ;;  %v2532_v5 = vsel %vm1116_vm6, %v1117_v55, %v1118_v56  ;;  %v2536_v6 = vsel %vm1116_vm6, %v1118_v56, %v1120_v0  ;;  %v701_v51 = vld [vmem:[%s2856_s5 + $0x40] sm:$0xff]  ;;  %v1766_v52 = vld [vmem:[%s2856_s5 + $0x88] sm:$0xff] }
  0x93   : > { %2010 = vmatprep.mubr.msk.f32.mxu1 %vm404_vm2, %v918_v62  ;;  %v2338_v62 = vmov 1983009808  }
  0x94   : > { %v713_v63 = vunpack.c.l.s4 %v2338_v62  ;;  %v1786_v62 = vld [vmem:[%s2856_s5 + $0xc0] sm:$0xff] }
  0x95   : > { %2190 = vmatpush3.bf16.msra.mxu1 %v2187_v39  ;;  %v2159_v39 = vpack.c.bf16 %v698_v36, %v697_v35 }
  0x96   : > { %2192 = vmatprep.subr.bf16.mxu1 %v2191_v42 }
  0x97   : > { %2160 = vmatprep.subr.bf16.mxu0 %v2159_v39 }
  0x98   : > { %2162 = vmatpush3.bf16.msra.mxu0 %v2159_v39 }
  0x99   : > { %2194 = vmatpush3.bf16.msra.mxu1 %v2191_v42  ;;  %v699_v42 = vld [vmem:[%s2856_s5 + $0x30] sm:$0xff] }
  0x9a   : > { %2196 = vmatprep.subr.bf16.mxu1 %v2195_v50  ;;  %v2163_v46 = vpack.c.bf16 %v700_v44, %v699_v42  ;;  %v1774_v42 = vld [vmem:[%s2855_s4 + $0xb8] sm:$0xff]  ;;  %v1775_v44 = vld [vmem:[%s2855_s4 + $0xc0] sm:$0xff] }
  0x9c   : > { %2164 = vmatprep.subr.bf16.mxu0 %v2163_v46 }
  0x9d   : > { %2198 = vmatpush3.bf16.msra.mxu1 %v2195_v50  ;;  %v2211_v50 = vpack.c.bf16 %v1765_v48, %v1764_v45  ;;  %2166 = vmatpush3.bf16.msra.mxu0 %v2163_v46  ;;  %v1776_v45 = vld [vmem:[%s2855_s4 + $0xc8] sm:$0xff] }
  0x9e   : > { %2008 = vmatprep.subr.mxu1 %v1755_v58  ;;  %1966 = vmatprep.subr.mxu0 %v701_v51  ;;  %v2227_v46 = vpack.c.bf16 %v1776_v45, %v1775_v44  ;;  %v1364_v44 = vld [vmem:[%s2859_s8 + $0x18] sm:$0xff] }
  0xa1   : > { %2009 = vmatpush3.msra.mxu1 %v1755_v58  ;;  %1967 = vmatpush3.msra.mxu0 %v701_v51 }
  0xa2   : > { %2011 = vmatmul.mubr.msk.f32.vlgmr.msra.gmra.mrb[0].mxu1 %vm404_vm2, %v920_v4  ;;  %2200 = vmatprep.subr.bf16.mxu1 %v2199_v26 }
  0xa3   : > { %2202 = vmatpush3.bf16.msra.mxu1 %v2199_v26 }
  0xa4   : > { %2204 = vmatprep.subr.bf16.mxu1 %v2203_v34 }
  0xa7   : > { %2206 = vmatpush3.bf16.msra.mxu1 %v2203_v34  ;;  %v1772_v34 = vld [vmem:[%s2855_s4 + $0xa8] sm:$0xff] }
  0xa8   : > { %2208 = vmatprep.subr.bf16.mxu1 %v2207_v43  ;;  %v2219_v40 = vpack.c.bf16 %v1772_v34, %v1771_v33 }
  0xab   : > { %2210 = vmatpush3.bf16.msra.mxu1 %v2207_v43  ;;  %v2223_v43 = vpack.c.bf16 %v1774_v42, %v1773_v41 }
  0xac   : > { %2212 = vmatprep.subr.bf16.mxu1 %v2211_v50 }
  0xaf   : > { %2214 = vmatpush3.bf16.msra.mxu1 %v2211_v50  ;;  %v1781_v50 = vld [vmem:[%s2856_s5 + $0x98] sm:$0xff] }
  0xb0   : > { %2029 = vmatprep.subr.mxu1 %v1766_v52 }
  0xb3   : > { %2030 = vmatpush3.msra.mxu1 %v1766_v52 }
  0xea   : > { %v520_v57 = vpop.f32.mrb[0].mxu0 }
  0xeb   : > { %v521_v60 = vadd.f32 %v1741_v53, %v520_v57  ;;  %v1949_v61 = vpop.f32.mrb[1].mxu0  ;;  %v1769_v53 = vld [vmem:[%s2855_s4 + $0x90] sm:$0xff] }
  0xed   : > { %v525_v2 = vcombine.high %v521_v60, %v521_v60  ;;  %v532_v3 = vrot.slane %v521_v60, %v531_v54 }
  0xef   : > { %v540_v7 = vcombine.high %v532_v3, %v532_v3  ;;  %v548_v8 = vrot.slane %v532_v3, %v531_v54  ;;  %v539_v9 = vrot.slane %v525_v2, %v531_v54  ;;  %v714_v2 = vunpack.c.0.s8 %v713_v63  ;;  %v1787_v63 = vld [vmem:[%s2856_s5 + $0xc8] sm:$0xff] }
  0xf1   : > { %v577_v10 = vrot.slane %v548_v8, %v2527_v1  ;;  %v570_v11 = vcombine.high %v548_v8, %v548_v8  ;;  %v562_v12 = vrot.slane %v540_v7, %v531_v54  ;;  %v555_v15 = vrot.slane %v539_v9, %v531_v54 }
  0xf2   : > { %v541_v16 = vcombine.high %v539_v9, %v539_v9  ;;  %v2638_v9 = vsub.s32 %v714_v2, %v2510_v47  ;;  %v1788_v2 = vld [vmem:[%s2856_s5 + $0xd0] sm:$0xff] }
  0xf3   : > { %639 = vrot.lane.b32.xlu0 %v577_v10, %s2337_s19  ;;  %606 = vrot.lane.b32.xlu1 %v577_v10, %s2335_s22  ;;  %v585_v13 = vrot.slane %v570_v11, %v2527_v1  ;;  %v581_v14 = vrot.slane %v562_v12, %v2527_v1  ;;  %v593_v17 = vrot.slane %v555_v15, %v2527_v1 }
  0xf4   : > { %v572_v18 = vcombine.high %v562_v12, %v562_v12  ;;  %v569_v22 = vrot.slane %v541_v16, %v531_v54  ;;  %v571_v30 = vcombine.high %v555_v15, %v555_v15  ;;  %v1770_v54 = vld [vmem:[%s2855_s4 + $0x98] sm:$0xff] }
  0xf5   : > { %v2621_v55 = vpack.c.bf16 %v1770_v54, %v1769_v53  ;;  %v1782_v53 = vld [vmem:[%s2856_s5 + $0xa0] sm:$0xff]  ;;  %v1783_v54 = vld [vmem:[%s2856_s5 + $0xa8] sm:$0xff] }
  0xf6   : > { %v589_v21 = vrot.slane %v572_v18, %v2527_v1  ;;  %v597_v29 = vrot.slane %v569_v22, %v2527_v1  ;;  %v601_v37 = vrot.slane %v571_v30, %v2527_v1  ;;  %v573_v38 = vcombine.high %v569_v22, %v569_v22 }
  0xf7   : > { %610 = vrot.lane.b32.xlu0 %v585_v13, %s2335_s22  ;;  %608 = vrot.lane.b32.xlu1 %v581_v14, %s2335_s22 }
  0xf8   : > { %v605_v49 = vrot.slane %v573_v38, %v2527_v1  ;;  %2216 = vmatprep.subr.bf16.mxu1 %v2621_v55 }
  0xfb   : > { %641 = vrot.lane.b32.xlu1 %v581_v14, %s2337_s19  ;;  %614 = vrot.lane.b32.xlu0 %v593_v17, %s2335_s22 }
  0xff   : > { %612 = vrot.lane.b32.xlu1 %v589_v21, %s2335_s22  ;;  %643 = vrot.lane.b32.xlu0 %v585_v13, %s2337_s19 }
 0x103   : > { %647 = vrot.lane.b32.xlu0 %v593_v17, %s2337_s19  ;;  %616 = vrot.lane.b32.xlu1 %v597_v29, %s2335_s22 }
 0x107   : > { %618 = vrot.lane.b32.xlu0 %v601_v37, %s2335_s22  ;;  %645 = vrot.lane.b32.xlu1 %v589_v21, %s2337_s19 }
 0x10b   : > { %651 = vrot.lane.b32.xlu0 %v601_v37, %s2337_s19  ;;  %620 = vrot.lane.b32.xlu1 %v605_v49, %s2335_s22 }
 0x10f   : > { %649 = vrot.lane.b32.xlu1 %v597_v29, %s2337_s19 }
 0x113   : > { %653 = vrot.lane.b32.xlu1 %v605_v49, %s2337_s19  ;;  %v1780_v49 = vld [vmem:[%s2856_s5 + $0x90] sm:$0xff] }
 0x165   : > { %v640_v56 = vpop.permute.xlu0 %639  ;;  %v607_v57 = vpop.permute.xlu1 %606 }
 0x166   : > { %664 = vst.msk [vmem:[#allocation3 + $0x2] sm:$0x1] %vm630_vm7, %v640_v56  ;;  %631 = vst.msk [vmem:[#allocation3 + $0x1] sm:$0x1] %vm630_vm7, %v607_v57  ;;  %v2235_v57 = vpack.c.bf16 %v1783_v54, %v1782_v53  ;;  %v1367_v53 = vld [vmem:[%s2859_s8 + $0x30] sm:$0xff]  ;;  %v1368_v54 = vld [vmem:[%s2859_s8 + $0x38] sm:$0xff] }
 0x169   : > { %v611_v58 = vpop.permute.xlu0 %610  ;;  %v609_v59 = vpop.permute.xlu1 %608 }
 0x16a   : > { %633 = vst.msk [vmem:[#allocation3 + $0x5] sm:$0x1] %vm630_vm7, %v611_v58  ;;  %632 = vst.msk [vmem:[#allocation3 + $0x3] sm:$0x1] %vm630_vm7, %v609_v59  ;;  %v1784_v59 = vld [vmem:[%s2856_s5 + $0xb0] sm:$0xff] }
 0x16d   : > { %v642_v60 = vpop.permute.xlu1 %641  ;;  %v615_v61 = vpop.permute.xlu0 %614  ;;  %v672_v8 = vld [vmem:[#allocation3] sm:$0x3] }
 0x16e   : > { %665 = vst.msk [vmem:[#allocation3 + $0x4] sm:$0x1] %vm630_vm7, %v642_v60  ;;  %635 = vst.msk [vmem:[#allocation3 + $0x9] sm:$0x1] %vm630_vm7, %v615_v61  ;;  %v1785_v60 = vld [vmem:[%s2856_s5 + $0xb8] sm:$0xff] }
 0x16f   : > { %v2239_v61 = vpack.c.bf16 %v1785_v60, %v1784_v59  ;;  %v1808_v59 = vld [vmem:[%s2859_s8 + $0xa0] sm:$0xff]  ;;  %v1809_v60 = vld [vmem:[%s2859_s8 + $0xa8] sm:$0xff] }
 0x171   : > { %v613_v0 = vpop.permute.xlu1 %612  ;;  %v644_v1 = vpop.permute.xlu0 %643  ;;  %v2633_v7 = vld [vmem:[#allocation3 + $0x2] sm:$0x3] }
 0x172   : > { %634 = vst.msk [vmem:[#allocation3 + $0x7] sm:$0x1] %vm630_vm7, %v613_v0  ;;  %666 = vst.msk [vmem:[#allocation3 + $0x6] sm:$0x1] %vm630_vm7, %v644_v1  ;;  %v710_v10 = vcombine.low %v672_v8, %v2633_v7  ;;  %v2243_v0 = vpack.c.bf16 %v1787_v63, %v1786_v62  ;;  %v1793_v8 = vld [vmem:[%s2859_s8 + $0x48] sm:$0xff] }
 0x174   : > { %v718_v16 = vrot.slane %v710_v10, %v2638_v9  ;;  %v1794_v10 = vld [vmem:[%s2859_s8 + $0x50] sm:$0xff] }
 0x175   : > { %v648_v3 = vpop.permute.xlu0 %647  ;;  %v617_v4 = vpop.permute.xlu1 %616  ;;  %v2641_v13 = vld [vmem:[#allocation3 + $0x4] sm:$0x3] }
 0x176   : > { %668 = vst.msk [vmem:[#allocation3 + $0xa] sm:$0x1] %vm630_vm7, %v648_v3  ;;  %636 = vst.msk [vmem:[#allocation3 + $0xb] sm:$0x1] %vm630_vm7, %v617_v4  ;;  %v1213_v51 = vcombine.low %v2633_v7, %v2641_v13 }
 0x178   : > { %v1221_v56 = vrot.slane %v1213_v51, %v2638_v9  ;;  %v1366_v51 = vld [vmem:[%s2859_s8 + $0x28] sm:$0xff] }
 0x179   : > { %v619_v11 = vpop.permute.xlu0 %618  ;;  %v646_v12 = vpop.permute.xlu1 %645  ;;  %v675_v14 = vld [vmem:[#allocation3 + $0x6] sm:$0x3] }
 0x17a   : > { %637 = vst.msk [vmem:[#allocation3 + $0xd] sm:$0x1] %vm630_vm7, %v619_v11  ;;  %667 = vst.msk [vmem:[#allocation3 + $0x8] sm:$0x1] %vm630_vm7, %v646_v12  ;;  %v711_v15 = vcombine.low %v2641_v13, %v675_v14  ;;  %v1795_v11 = vld [vmem:[%s2859_s8 + $0x58] sm:$0xff]  ;;  %v2247_v12 = vpack.c.bf16 %v1794_v10, %v1793_v8  ;;  %v1814_v10 = vld [vmem:[%s2859_s8 + $0xd0] sm:$0xff] }
 0x17c   : > { %v725_v17 = vrot.slane %v711_v15, %v2638_v9  ;;  %2248 = vmatprep.subr.bf16.mxu0 %v2247_v12 }
 0x17d   : > { %v652_v18 = vpop.permute.xlu0 %651  ;;  %v621_v47 = vpop.permute.xlu1 %620  ;;  %v2653_v23 = vld [vmem:[#allocation3 + $0xa] sm:$0x3] }
 0x17e   : > { %670 = vst.msk [vmem:[#allocation3 + $0xe] sm:$0x1] %vm630_vm7, %v652_v18  ;;  %638 = vst.msk [vmem:[#allocation3 + $0xf] sm:$0x1] %vm630_vm7, %v621_v47  ;;  %v726_v19 = vcombine.low %v718_v16, %v725_v17  ;;  %v1797_v16 = vld [vmem:[%s2859_s8 + $0x68] sm:$0xff]  ;;  %v1798_v17 = vld [vmem:[%s2859_s8 + $0x70] sm:$0xff] }
 0x17f   : > { %v2255_v18 = vpack.c.bf16 %v1798_v17, %v1797_v16  ;;  %v1799_v47 = vld [vmem:[%s2859_s8 + $0x78] sm:$0xff] }
 0x180   : > { %1968 = vmatprep.mubr.msk.f32.mxu0 %vm404_vm2, %v726_v19  ;;  %v1020_v35 = vrot.slane %v726_v19, 1  ;;  %v1800_v19 = vld [vmem:[%s2859_s8 + $0x80] sm:$0xff] }
 0x181   : > { %v650_v20 = vpop.permute.xlu1 %649  ;;  %v676_v22 = vld [vmem:[#allocation3 + $0x8] sm:$0x3] }
 0x182   : > { %669 = vst.msk [vmem:[#allocation3 + $0xc] sm:$0x1] %vm630_vm7, %v650_v20  ;;  %v727_v24 = vcombine.low %v676_v22, %v2653_v23  ;;  %v1214_v48 = vcombine.low %v675_v14, %v676_v22  ;;  %v2259_v20 = vpack.c.bf16 %v1800_v19, %v1799_v47  ;;  %v1791_v22 = vld [vmem:[%s2857_s6] ss:$0 sm:$0xff] }
 0x184   : > { %v735_v28 = vrot.slane %v727_v24, %v2638_v9  ;;  %v1228_v52 = vrot.slane %v1214_v48, %v2638_v9 }
 0x185   : > { %v654_v21 = vpop.permute.xlu1 %653  ;;  %v2658_v26 = vld [vmem:[#allocation3 + $0xe] sm:$0x3] }
 0x186   : > { %671 = vst.msk [vmem:[#allocation3 + $0x10] sm:$0x1] %vm630_vm7, %v654_v21  ;;  %v1229_v58 = vcombine.low %v1221_v56, %v1228_v52  ;;  %v1369_v56 = vld [vmem:[%s2859_s8 + $0x40] sm:$0xff] }
 0x189   : > { %v2656_v25 = vld [vmem:[#allocation3 + $0xc] sm:$0x3] }
 0x18a   : > { %v728_v27 = vcombine.low %v2656_v25, %v2658_v26 }
 0x18c   : > { %v742_v29 = vrot.slane %v728_v27, %v2638_v9  ;;  %v1792_v27 = vld [vmem:[%s2858_s7] ss:$0 sm:$0xff] }
 0x18d   : > { %v680_v30 = vld [vmem:[#allocation3 + $0x10] sm:$0x3] }
 0x18e   : > { %v743_v31 = vcombine.low %v735_v28, %v742_v29  ;;  %v1019_v32 = vrot.slane %v680_v30, %v2638_v9  ;;  %v1231_v1 = vcombine.low %v2658_v26, %v680_v30 }
 0x190   : > { %1969 = vmatmul.mubr.msk.f32.vlgmr.msra.gmra.mrb[2].mxu0 %vm404_vm2, %v743_v31  ;;  %v1021_v36 = vrot.slane %v743_v31, 1  ;;  %v1023_v37 = vrot.slane %v1019_v32, 1  ;;  %v1245_v3 = vrot.slane %v1231_v1, %v2638_v9  ;;  %v1361_v31 = vld [vmem:[%s2859_s8] sm:$0xff]  ;;  %v1362_v32 = vld [vmem:[%s2859_s8 + $0x8] sm:$0xff]  ;;  %v1810_v1 = vld [vmem:[%s2859_s8 + $0xb0] sm:$0xff] }
 0x191   : > { %2250 = vmatpush3.bf16.msra.mxu0 %v2247_v12  ;;  %v2263_v34 = vpack.c.bf16 %v1362_v32, %v1361_v31 }
 0x192   : > { %v1022_v38 = vsel %vm915_vm5, %v1020_v35, %v1021_v36  ;;  %v1024_v39 = vsel %vm915_vm5, %v1021_v36, %v1023_v37 }
 0x193   : > { %2031 = vmatprep.mubr.msk.f32.mxu1 %vm404_vm2, %v1022_v38 }
 0x194   : > { %2032 = vmatmul.mubr.msk.f32.vlgmr.msra.gmra.mrb[0].mxu1 %vm404_vm2, %v1024_v39 }
 0x195   : > { %2218 = vmatpush3.bf16.msra.mxu1 %v2621_v55  ;;  %2052 = vmatprep.mubr.msk.f32.mxu1 %vm404_vm2, %v2532_v5  ;;  %v1777_v5 = vld [vmem:[%s2855_s4 + $0xd0] sm:$0xff]  ;;  %v2231_v55 = vpack.c.bf16 %v1781_v50, %v1780_v49  ;;  %v1365_v50 = vld [vmem:[%s2859_s8 + $0x20] sm:$0xff] }
 0x196   : > { %2220 = vmatprep.subr.bf16.mxu1 %v2219_v40  ;;  %v2271_v52 = vpack.c.bf16 %v1366_v51, %v1365_v50 }
 0x199   : > { %2222 = vmatpush3.bf16.msra.mxu1 %v2219_v40  ;;  %v1363_v40 = vld [vmem:[%s2859_s8 + $0x10] sm:$0xff] }
 0x19a   : > { %2224 = vmatprep.subr.bf16.mxu1 %v2223_v43  ;;  %v2267_v49 = vpack.c.bf16 %v1364_v44, %v1363_v40 }
 0x19d   : > { %2226 = vmatpush3.bf16.msra.mxu1 %v2223_v43 }
 0x19e   : > { %2228 = vmatprep.subr.bf16.mxu1 %v2227_v46 }
 0x1a1   : > { %2230 = vmatpush3.bf16.msra.mxu1 %v2227_v46 }
 0x1a2   : > { %2050 = vmatprep.subr.mxu1 %v1777_v5 }
 0x1a5   : > { %2051 = vmatpush3.msra.mxu1 %v1777_v5 }
 0x1a6   : > { %2053 = vmatmul.mubr.msk.f32.vlgmr.msra.gmra.mrb[0].mxu1 %vm404_vm2, %v2536_v6  ;;  %2232 = vmatprep.subr.bf16.mxu1 %v2231_v55  ;;  %v1230_v6 = vcombine.low %v2653_v23, %v2656_v25  ;;  %v1801_v25 = vld [vmem:[%s2859_s8 + $0x88] sm:$0xff] }
 0x1a7   : > { %2234 = vmatpush3.bf16.msra.mxu1 %v2231_v55  ;;  %2073 = vmatprep.mubr.msk.f32.mxu1 %vm404_vm2, %v1229_v58  ;;  %v2275_v55 = vpack.c.bf16 %v1368_v54, %v1367_v53  ;;  %v1807_v58 = vld [vmem:[%s2859_s8 + $0x98] sm:$0xff] }
 0x1a8   : > { %2236 = vmatprep.subr.bf16.mxu1 %v2235_v57  ;;  %v1238_v4 = vrot.slane %v1230_v6, %v2638_v9  ;;  %v1796_v9 = vld [vmem:[%s2859_s8 + $0x60] sm:$0xff]  ;;  %v1811_v6 = vld [vmem:[%s2859_s8 + $0xb8] sm:$0xff] }
 0x1a9   : > { %v2251_v13 = vpack.c.bf16 %v1796_v9, %v1795_v11  ;;  %v1817_v9 = vld [vmem:[%s2860_s9] ss:$0 sm:$0xff] }
 0x1aa   : > { %v1246_v7 = vcombine.low %v1238_v4, %v1245_v3  ;;  %v2287_v3 = vpack.c.bf16 %v1811_v6, %v1810_v1  ;;  %v1812_v4 = vld [vmem:[%s2859_s8 + $0xc0] sm:$0xff] }
 0x1ab   : > { %2238 = vmatpush3.bf16.msra.mxu1 %v2235_v57  ;;  %2252 = vmatprep.subr.bf16.mxu0 %v2251_v13  ;;  %v1806_v57 = vld [vmem:[%s2859_s8 + $0x90] sm:$0xff] }
 0x1ac   : > { %2240 = vmatprep.subr.bf16.mxu1 %v2239_v61  ;;  %2254 = vmatpush3.bf16.msra.mxu0 %v2251_v13 }
 0x1ad   : > { %2256 = vmatprep.subr.bf16.mxu0 %v2255_v18 }
 0x1af   : > { %2242 = vmatpush3.bf16.msra.mxu1 %v2239_v61  ;;  %v2279_v61 = vpack.c.bf16 %v1807_v58, %v1806_v57 }
 0x1b0   : > { %2244 = vmatprep.subr.bf16.mxu1 %v2243_v0  ;;  %2258 = vmatpush3.bf16.msra.mxu0 %v2255_v18 }
 0x1b1   : > { %2260 = vmatprep.subr.bf16.mxu0 %v2259_v20 }
 0x1b3   : > { %2246 = vmatpush3.bf16.msra.mxu1 %v2243_v0  ;;  %v2283_v0 = vpack.c.bf16 %v1809_v60, %v1808_v59 }
 0x1b4   : > { %2071 = vmatprep.subr.mxu1 %v1788_v2  ;;  %2262 = vmatpush3.bf16.msra.mxu0 %v2259_v20 }
 0x1b5   : > { %2092 = vmatprep.subr.mxu0 %v1801_v25 }
 0x1b7   : > { %2072 = vmatpush3.msra.mxu1 %v1788_v2 }
 0x1b8   : > { %2074 = vmatmul.mubr.msk.f32.vlgmr.msra.gmra.mrb[0].mxu1 %vm404_vm2, %v1246_v7  ;;  %2093 = vmatpush3.msra.mxu0 %v1801_v25  ;;  %v1813_v7 = vld [vmem:[%s2859_s8 + $0xc8] sm:$0xff] }
 0x1b9   : > { %2264 = vmatprep.subr.bf16.mxu0 %v2263_v34  ;;  %v2291_v8 = vpack.c.bf16 %v1813_v7, %v1812_v4 }
 0x263   : > { %v1970_v14 = vpop.f32.mrb[2].mxu0 }
 0x264   : > { %v814_v15 = vpop.f32.mrb[3].mxu0 }
 0x28b   : > { %v2075_v21 = vpop.f32.mrb[0].mxu1 }
 0x28c   : > { %v2295_v23 = vadd.f32 %v2075_v21, %v1970_v14  ;;  %v1317_v24 = vpop.f32.mrb[1].mxu1  ;;  %v1818_v14 = vld [vmem:[%s2861_s10] ss:$0 sm:$0xff] }
 0x28d   : > { %v2296_v26 = vadd.f32 %v1317_v24, %v814_v15 }
 0x28e   : > { %v1336_v28 = vmul.f32 %v2295_v23, %v1791_v22 }
 0x28f   : > { %v1335_v29 = vmul.f32 %v2296_v26, %v1791_v22 }
 0x290   : > { %v1345_v30 = vadd.f32 %v1792_v27, %v1336_v28 }
 0x291   : > { %v1344_v33 = vadd.f32 %v1792_v27, %v1335_v29 }
 0x292   : > { %v1347_v35 = vmax.f32 %v1345_v30, 0.0 }
 0x293   : > { %v1346_v36 = vmax.f32 %v1344_v33, 0.0 }
 0x294   : > { %1352 = vrot.lane.b32.xlu1 %v1347_v35, %s2335_s22 }
 0x295   : > { %1350 = vrot.lane.b32.xlu0 %v1346_v36, %s2335_s22 }
 0x306   : > { %v1353_v37 = vpop.permute.xlu1 %1352 }
 0x307   : > { %1357 = vst.msk [vmem:[#allocation4 + $0x9] sm:$0xff] %vm431_vm3, %v1353_v37  ;;  %v1351_v38 = vpop.permute.xlu0 %1350 }
 0x308   : > { %1356 = vst.msk [vmem:[#allocation4 + $0x1] sm:$0xff] %vm431_vm3, %v1351_v38 }
 0x30e   : > { %v1360_v39 = vld [vmem:[#allocation4 + $0x10] sm:$0x3] }
 0x30f   : > { %v1358_v41 = vld [vmem:[#allocation4] sm:$0xff]  ;;  %v1359_v42 = vld [vmem:[#allocation4 + $0x8] sm:$0xff]  ;;  %v1386_v43 = vrot.slane %v1360_v39, 1  ;;  %v1559_v11 = vrot.slane %v1360_v39, 2 }
 0x310   : > { %v1383_v45 = vrot.slane %v1358_v41, 1  ;;  %v1384_v46 = vrot.slane %v1359_v42, 1  ;;  %v1556_v62 = vrot.slane %v1358_v41, 2  ;;  %v1557_v63 = vrot.slane %v1359_v42, 2 }
 0x312   : > { %v1385_v48 = vsel %vm915_vm5, %v1383_v45, %v1384_v46  ;;  %v1387_v5 = vsel %vm915_vm5, %v1384_v46, %v1386_v43  ;;  %v1558_v2 = vsel %vm1116_vm6, %v1556_v62, %v1557_v63  ;;  %v1560_v12 = vsel %vm1116_vm6, %v1557_v63, %v1559_v11 }
 0x313   : > { %2094 = vmatprep.mubr.msk.f32.mxu0 %vm404_vm2, %v1385_v48 }
 0x314   : > { %2095 = vmatmul.mubr.msk.f32.vlgmr.msra.gmra.mrb[4].mxu0 %vm404_vm2, %v1387_v5 }
 0x315   : > { %2266 = vmatpush3.bf16.msra.mxu0 %v2263_v34  ;;  %2115 = vmatprep.mubr.msk.f32.mxu0 %vm404_vm2, %v1358_v41 }
 0x316   : > { %2268 = vmatprep.subr.bf16.mxu0 %v2267_v49 }
 0x319   : > { %2270 = vmatpush3.bf16.msra.mxu0 %v2267_v49 }
 0x31a   : > { %2272 = vmatprep.subr.bf16.mxu0 %v2271_v52 }
 0x31d   : > { %2274 = vmatpush3.bf16.msra.mxu0 %v2271_v52 }
 0x31e   : > { %2276 = vmatprep.subr.bf16.mxu0 %v2275_v55 }
 0x321   : > { %2278 = vmatpush3.bf16.msra.mxu0 %v2275_v55 }
 0x322   : > { %2113 = vmatprep.subr.mxu0 %v1369_v56 }
 0x325   : > { %2114 = vmatpush3.msra.mxu0 %v1369_v56 }
 0x326   : > { %2116 = vmatmul.mubr.msk.f32.vlgmr.msra.gmra.mrb[4].mxu0 %vm404_vm2, %v1359_v42  ;;  %2280 = vmatprep.subr.bf16.mxu0 %v2279_v61 }
 0x327   : > { %2282 = vmatpush3.bf16.msra.mxu0 %v2279_v61  ;;  %2136 = vmatprep.mubr.msk.f32.mxu0 %vm404_vm2, %v1558_v2 }
 0x328   : > { %2284 = vmatprep.subr.bf16.mxu0 %v2283_v0 }
 0x32b   : > { %2286 = vmatpush3.bf16.msra.mxu0 %v2283_v0 }
 0x32c   : > { %2288 = vmatprep.subr.bf16.mxu0 %v2287_v3 }
 0x32f   : > { %2290 = vmatpush3.bf16.msra.mxu0 %v2287_v3 }
 0x330   : > { %2292 = vmatprep.subr.bf16.mxu0 %v2291_v8 }
 0x333   : > { %2294 = vmatpush3.bf16.msra.mxu0 %v2291_v8 }
 0x334   : > { %2134 = vmatprep.subr.mxu0 %v1814_v10 }
 0x337   : > { %2135 = vmatpush3.msra.mxu0 %v1814_v10 }
 0x338   : > { %2137 = vmatmul.mubr.msk.f32.vlgmr.msra.gmra.mrb[4].mxu0 %vm404_vm2, %v1560_v12 }
 0x40b   : > { %v2138_v13 = vpop.f32.mrb[4].mxu0 }
 0x40c   : > { %v1650_v15 = vmul.f32 %v2138_v13, %v1817_v9  ;;  %v1631_v16 = vpop.f32.mrb[5].mxu0 }
 0x40d   : > { %v1649_v17 = vmul.f32 %v1817_v9, %v1631_v16 }
 0x40e   : > { %v1659_v18 = vadd.f32 %v1818_v14, %v1650_v15 }
 0x40f   : > { %v1658_v47 = vadd.f32 %v1818_v14, %v1649_v17 }
 0x410   : > { %v1661_v19 = vmax.f32 %v1659_v18, 0.0 }
 0x411   : > { %v1660_v20 = vmax.f32 %v1658_v47, 0.0 }
 0x412   : > { %1663 = vst.msk [vmem:[%s403_s20 + $0x8] sm:$0xff] %vm450_vm1, %v1661_v19 }
 0x413   : > { %1662 = vst.msk [vmem:[%s403_s20] sm:$0xff] %vm450_vm1, %v1660_v20 }
 0x414 PF: > { %s21_s17 = sadd.s32 1, %s2330_s17  }
 0x415   : > { %p18_p4 = scmp.ge.s32.totalorder %s21_s17, 4  }
 0x417   :  { %20 = sbr.rel (!%p18_p4) target bundleno = 1 (0x1), region = 104 }

</bundles_post_ra>
